<compile_context>
chip_gen: v7x
topology: tpu7x:2x2x1
jax: 0.10.0
libtpu: 0.0.40
codegen_flags: <defaults>
</compile_context>

<pallas_src>
import math

import jax
import jax.numpy as jnp
from jax.experimental import pallas as pl
from jax.experimental.pallas import tpu as pltpu

IN_FEATURES = 784
OUT_FEATURES = 512


def _fused_permute_linear_kernel(x_ref, w_ref, b_ref, o_ref):
    """sigmoid(tanh(x.T @ W + b)) for one (batch, seq-tile) block.

    x_ref: (1, K, tm)  raw (un-permuted) x1 tile; contracting dim 0 of the
                       LHS folds permute(0, 2, 1) into the matmul.
    w_ref: (K, N)      full weight, resident across the whole grid.
    b_ref: (1, N)      bias, resident.
    o_ref: (1, tm, N)  output tile (lane-dense: N = 512).
    """
    x = x_ref[0]                                   # (K, tm)
    acc = jax.lax.dot_general(
        x, w_ref[...],
        dimension_numbers=(((0,), (0,)), ((), ())),  # x.T @ W -> (tm, N)
        preferred_element_type=jnp.float32)
    acc = acc + b_ref[...]                         # broadcast bias over rows
    acc = jax.nn.sigmoid(jnp.tanh(acc))
    o_ref[0] = acc.astype(o_ref.dtype)


def _choose_seq_tile(S, tm_max=512):
    """Pick the seq-tile size: full S when small, else a 128-multiple divisor."""
    if S <= tm_max:
        return S
    for tm in (tm_max, 256, 128):
        if S % tm == 0:
            return tm
    return S  # fallback: whole sequence per batch element


def permute_linear_act(x1, weight, bias, *, tm_max=512):
    """Computes sigmoid(tanh(linear(x1.permute(0, 2, 1), weight, bias))).

    x1:     (B, 784, S) float32
    weight: (512, 784)  float32  (PyTorch nn.Linear layout: (out, in))
    bias:   (512,)      float32
    returns (B, S, 512) float32
    """
    B, K, S = x1.shape
    N, K2 = weight.shape
    assert K == IN_FEATURES and K2 == K and bias.shape == (N,)

    # Tiny one-time layout fixes (weight is only 1.6 MB); x1 itself is NOT
    # transposed in HBM — the permute happens inside the kernel contraction.
    w_t = weight.T                  # (K, N)
    b2d = bias.reshape(1, N)        # (1, N)

    tm = _choose_seq_tile(S, tm_max)
    grid = (B, pl.cdiv(S, tm))

    cost = pl.CostEstimate(
        flops=2 * B * S * K * N,
        transcendentals=2 * B * S * N,
        bytes_accessed=4 * (B * S * K + K * N + B * S * N),
    )

    out = pl.pallas_call(
        _fused_permute_linear_kernel,
        out_shape=jax.ShapeDtypeStruct((B, S, N), x1.dtype),
        grid=grid,
        in_specs=[
            pl.BlockSpec((1, K, tm), lambda b, s: (b, 0, s)),  # x1 tile, no HBM permute
            pl.BlockSpec((K, N), lambda b, s: (0, 0)),         # weight: VMEM-resident
            pl.BlockSpec((1, N), lambda b, s: (0, 0)),         # bias: VMEM-resident
        ],
        out_specs=pl.BlockSpec((1, tm, N), lambda b, s: (b, s, 0)),
        compiler_params=pltpu.CompilerParams(
            dimension_semantics=("parallel", "parallel"),
        ),
        cost_estimate=cost,
    )(x1, w_t, b2d)

    return out


def _reference(x1, weight, bias):
    v1 = jnp.transpose(x1, (0, 2, 1))
    v2 = jnp.einsum("bsk,nk->bsn", v1, weight) + bias
    return jax.nn.sigmoid(jnp.tanh(v2))


if __name__ == "__main__":
    key = jax.random.PRNGKey(0)
    kx, kw, kb = jax.random.split(key, 3)

    # Small, module-consistent shapes: batch=2, seq=8, feature dim fixed at 784.
    B, S = 2, 8
    x1 = jax.random.normal(kx, (B, IN_FEATURES, S), dtype=jnp.float32)

    # Deterministic nn.Linear(784, 512)-style init.
    bound = 1.0 / math.sqrt(IN_FEATURES)
    weight = jax.random.uniform(
        kw, (OUT_FEATURES, IN_FEATURES), jnp.float32, -bound, bound)
    bias = jax.random.uniform(kb, (OUT_FEATURES,), jnp.float32, -bound, bound)

    out = jax.block_until_ready(permute_linear_act(x1, weight, bias))
    ref = _reference(x1, weight, bias)
    assert out.shape == (B, S, OUT_FEATURES)
    assert jnp.allclose(out, ref, atol=1e-4, rtol=1e-4)

    # Also exercise the M-tiled (multi seq-tile) path at a modest size.
    S2 = 1024
    x1b = jax.random.normal(kx, (1, IN_FEATURES, S2), dtype=jnp.float32)
    out2 = jax.block_until_ready(permute_linear_act(x1b, weight, bias))
    ref2 = _reference(x1b, weight, bias)
    assert out2.shape == (1, S2, OUT_FEATURES)
    assert jnp.allclose(out2, ref2, atol=1e-4, rtol=1e-4)

    print("KERNEL_OK")
</pallas_src>

<mosaic_0001>
module attributes {stable_mosaic.version = 11 : i64} {
  func.func @_fused_permute_linear_kernel(%arg0: i32, %arg1: i32, %arg2: memref<1x784x8xf32, #tpu.memory_space<vmem>>, %arg3: memref<784x512xf32, #tpu.memory_space<vmem>>, %arg4: memref<1x512xf32, #tpu.memory_space<vmem>>, %arg5: memref<1x8x512xf32, #tpu.memory_space<vmem>>) attributes {dimension_semantics = [#tpu.dimension_semantics<parallel>, #tpu.dimension_semantics<parallel>], iteration_bounds = array<i64: 2, 1>, scalar_prefetch = 0 : i64, scratch_operands = 0 : i64, tpu.core_type = #tpu.core_type<tc>, window_params = [{transform_indices = @transform_0, window_bounds = array<i64: 1, 784, 8>}, {pipeline_mode = #tpu.pipeline_mode<synchronous>, transform_indices = @transform_1, window_bounds = array<i64: 784, 512>}, {pipeline_mode = #tpu.pipeline_mode<synchronous>, transform_indices = @transform_2, window_bounds = array<i64: 1, 512>}, {transform_indices = @transform_3, window_bounds = array<i64: 1, 8, 512>}]} {
    %c0 = arith.constant 0 : index
    %c0_0 = arith.constant 0 : index
    %c0_1 = arith.constant 0 : index
    %0 = vector.load %arg2[%c0, %c0_0, %c0_1] : memref<1x784x8xf32, #tpu.memory_space<vmem>>, vector<1x784x8xf32>
    %1 = vector.shape_cast %0 : vector<1x784x8xf32> to vector<784x8xf32>
    %c0_2 = arith.constant 0 : index
    %c0_3 = arith.constant 0 : index
    %2 = vector.load %arg3[%c0_2, %c0_3] : memref<784x512xf32, #tpu.memory_space<vmem>>, vector<784x512xf32>
    %cst = arith.constant dense<0.000000e+00> : vector<8x512xf32>
    %3 = tpu.matmul %1, %2, %cst {dimension_numbers = #tpu.dot_dimension_numbers<[0], [0], [1], [1], [0, 1, 1, 1], [], []>} : vector<784x8xf32>, vector<784x512xf32>, vector<8x512xf32> -> vector<8x512xf32>
    %c0_4 = arith.constant 0 : index
    %c0_5 = arith.constant 0 : index
    %4 = vector.load %arg4[%c0_4, %c0_5] : memref<1x512xf32, #tpu.memory_space<vmem>>, vector<1x512xf32>
    %5 = vector.broadcast %4 : vector<1x512xf32> to vector<8x512xf32>
    %6 = arith.addf %3, %5 : vector<8x512xf32>
    %7 = math.tanh %6 : vector<8x512xf32>
    %8 = arith.negf %7 : vector<8x512xf32>
    %9 = math.exp %8 : vector<8x512xf32>
    %cst_6 = arith.constant 1.000000e+00 : f32
    %10 = vector.broadcast %cst_6 : f32 to vector<8x512xf32>
    %11 = arith.addf %10, %9 : vector<8x512xf32>
    %12 = arith.divf %10, %11 : vector<8x512xf32>
    %c0_7 = arith.constant 0 : index
    %c0_8 = arith.constant 0 : index
    %c0_9 = arith.constant 0 : index
    %13 = vector.load %arg5[%c0_7, %c0_8, %c0_9] : memref<1x8x512xf32, #tpu.memory_space<vmem>>, vector<1x8x512xf32>
    %14 = vector.shape_cast %13 : vector<1x8x512xf32> to vector<8x512xf32>
    %15 = vector.shape_cast %12 : vector<8x512xf32> to vector<1x8x512xf32>
    tpu.vector_store %arg5[%c0_7, %c0_8, %c0_9], %15 {strides = array<i32>} : memref<1x8x512xf32, #tpu.memory_space<vmem>>, vector<1x8x512xf32>,
    return
  }
  func.func @transform_0(%arg0: i32, %arg1: i32) -> (i32, i32, i32) {
    %c0_i32 = arith.constant 0 : i32
    %c0_i32_0 = arith.constant 0 : i32
    return %arg0, %c0_i32, %arg1 : i32, i32, i32
  }
  func.func @transform_1(%arg0: i32, %arg1: i32) -> (i32, i32) {
    %c0_i32 = arith.constant 0 : i32
    %c0_i32_0 = arith.constant 0 : i32
    %c0_i32_1 = arith.constant 0 : i32
    return %c0_i32, %c0_i32_0 : i32, i32
  }
  func.func @transform_2(%arg0: i32, %arg1: i32) -> (i32, i32) {
    %c0_i32 = arith.constant 0 : i32
    %c0_i32_0 = arith.constant 0 : i32
    %c0_i32_1 = arith.constant 0 : i32
    return %c0_i32, %c0_i32_0 : i32, i32
  }
  func.func @transform_3(%arg0: i32, %arg1: i32) -> (i32, i32, i32) {
    %c0_i32 = arith.constant 0 : i32
    %c0_i32_0 = arith.constant 0 : i32
    return %arg0, %arg1, %c0_i32 : i32, i32, i32
  }
}

</mosaic_0001>

<bundles_post_ra>
// kernel: tpu_custom_call.1
= control target key start
LH: loop header
LB: loop body
LE: loop exit
PB: predicated region body
PF: predicated region fallthrough
CT: control target
= control target key end

     0   :  { %8 = vsyncpa [#allocation3], 0  ;;  %s2800_s0 = inlined_call_operand.vmem [shape: f32[2,784,8], index: 0, kind: input, shape index: {}]   ;;  %s2801_s1 = inlined_call_operand.hbm [shape: f32[784,512], index: 1, kind: input, shape index: {}]   ;;  %s2802_s2 = inlined_call_operand.hbm [shape: f32[1,512], index: 2, kind: input, shape index: {}]   ;;  %s2803_s3 = inlined_call_operand.hbm [shape: f32[2,8,512], index: 3, kind: output, shape index: {}]  }
   0x1   :  { %9 = vsyncpa [#allocation6], 0 }
   0x2   :  { %10 = vsyncpa [#allocation4], 0 }
   0x3   :  { %12 = vsyncpa [#allocation4 + $0x1], 0  ;;  %s2493_s12 = smov 0   ;;  %s2495_s13 = smov 0  }
   0x4   :  { %s2497_s14 = smov 0   ;;  %s2499_s15 = smov 0  }
   0x5   :  { %s2501_s16 = smov 0   ;;  %s2503_s17 = smov 0  }
   0x6 LB: > { %s1677_s18 = sadd.s32 4294967295, %s2465_s17   ;;  %s1678_s19 = sadd.s32 4294967294, %s2465_s17   ;;  %s2465_s17 = sphi %s2503_s17, %s18_s17   ;;  %s2461_s16 = sphi %s2501_s16, %s2821_s16   ;;  %s2457_s15 = sphi %s2499_s15, %s2820_s15   ;;  %s2453_s14 = sphi %s2497_s14, %s2819_s14   ;;  %s2449_s13 = sphi %s2495_s13, %s2818_s13   ;;  %s2445_s12 = sphi %s2493_s12, %s2817_s12  }
   0x7   : > { %s30_s20 = sadd.s32 1, %s2461_s16  ;;  %s109_s21 = sadd.s32 1, %s2453_s14 }
   0x8   : > { %p32_p0 = scmp.ge.s32.totalorder %s30_s20, 2  ;;  %p119_p1 = scmp.ne.s32.totalorder %s2453_s14, %s2449_s13 }
   0x9   : > { %p120_p2 = scmp.eq.s32.totalorder %s1677_s18, 1  ;;  %p125_p3 = scmp.ne.s32.totalorder %s2449_s13, %s2445_s12 }
   0xa   : > { %s2823_s20 = smov (%p32_p0, %s30_s20), 0  ;;  %p126_p5 = scmp.eq.s32.totalorder %s1678_s19, 1 }
   0xb   : > { %p2533_p4 = por %p120_p2, %p119_p1  ;;  %s104_s23 = ssub.s32 %s2461_s16, %s2823_s20 }
   0xc   : > { %p1679_p6 = scmp.ge.s32.totalorder %s2465_s17, 1  ;;  %p107_p7 = scmp.eq.s32.totalorder %s104_s23, 0 }
   0xd   : > { %s2808_s22 = scalar_select %p2533_p4, 1, 0 }
   0xe   : > { %p2540_p8 = por %p126_p5, %p125_p3  ;;  %p133_p9 = scmp.lt.s32.totalorder %s2465_s17, 3 }
   0xf   : > { %s2546_s25 = scalar_select %p107_p7, %s2453_s14, %s109_s21  }
  0x10   : > { %s2809_s24 = scalar_select %p2540_p8, 1, 0 }
  0x11   : > { %p2548_p10 = pnand %p1679_p6, %p133_p9  ;;  %p2552_p11 = scmp.eq.s32.totalorder %s1677_s18, 0 }
  0x12   : > { %s2467_s28 = smov [#allocation2]   ;;  %s2468_s4 = smov [#allocation5]  }
  0x13   : > { %s2810_s26 = scalar_select %p2548_p10, 1, 0 }
  0x14   : > { %s2811_s27 = scalar_select %p2552_p11, 1, 0 }
  0x15   : > { %p2119_p12 = pneg %p2548_p10  ;;  %s145_s29 = sshll.u32 %s2467_s28, 4  ;;  %s146_s29 = int_to_ptr.vmem [resolvable:$true] %s145_s29 }
  0x16   : > { %s159_s5 = sshll.u32 %s2468_s4, 4  ;;  %s2323_s8 = scalar_lea.hbm %s2801_s1, 50176  ;;  %s2564_s5 = int_to_ptr.vmem [resolvable:$true] %s159_s5 }
  0x17   : > { %p2560_p13 = pnand %p2552_p11, %p2119_p12  ;;  %p2324_p0 = scmp.ne.s32.totalorder %s2801_s1, %s2323_s8 }
  0x18   : > { %p2330_p5 = scmp.lt.u32.totalorder %s2323_s8, %s2801_s1 }
  0x19   : > { %p2325_p1 = pneg %p2560_p13 }
  0x1b   : > { %p2326_p2 = pnand %p2325_p1, %p2324_p0 }
  0x1d   : > { %p2327_p3 = pneg %p2326_p2 }
  0x1f   : > { %p2332_p6 = pnand %p2330_p5, %p2327_p3 }
  0x21   : > { %2335 = shalt.err (!%p2332_p6)
}
  0x22   : > { %s2336_s19 = scalar_lea.vmem %s146_s29, 50176  ;;  %p2344_p8 = scmp.lt.s32.totalorder %s146_s29, %s146_s29 }
  0x23   : > { %p2337_p7 = scmp.ne.s32.totalorder %s146_s29, %s2336_s19  ;;  %p2345_p4 = scmp.lt.s32.totalorder %s2336_s19, %s2336_s19 }
  0x25   : > { %p2339_p9 = pnand %p2337_p7, %p2325_p1  ;;  %p2346_p11 = por %p2345_p4, %p2344_p8 }
  0x27   : > { %p2340_p12 = pneg %p2339_p9 }
  0x29   : > { %p2347_p10 = pnand %p2346_p11, %p2340_p12 }
  0x2b   : > { %2350 = shalt.err (!%p2347_p10)
}
  0x2c   : > { %s2469_s21 = smov 512   ;;  %s2470_s23 = smov 32  }
  0x2d   : > { %2122 = dma.hbm_to_vmem [thread:$0]  (!%p2560_p13), %s2801_s1, 50176, %s146_s29, [#allocation3], %s2469_s21, %s2469_s21, %s2470_s23  }
  0x2e   : > { %s2351_s8 = scalar_lea.hbm %s2802_s2, 64 }
  0x2f   : > { %p2352_p0 = scmp.ne.s32.totalorder %s2802_s2, %s2351_s8  ;;  %p2358_p10 = scmp.lt.u32.totalorder %s2351_s8, %s2802_s2 }
  0x31   : > { %p2354_p4 = pnand %p2352_p0, %p2325_p1 }
  0x33   : > { %p2355_p8 = pneg %p2354_p4 }
  0x35   : > { %p2360_p11 = pnand %p2358_p10, %p2355_p8 }
  0x37   : > { %2363 = shalt.err (!%p2360_p11)
}
  0x38   : > { %s2364_s29 = scalar_lea.vmem %s2564_s5, 64  ;;  %p2372_p6 = scmp.lt.s32.totalorder %s2564_s5, %s2564_s5 }
  0x39   : > { %p2365_p2 = scmp.ne.s32.totalorder %s2564_s5, %s2364_s29  ;;  %p2373_p7 = scmp.lt.s32.totalorder %s2364_s29, %s2364_s29 }
  0x3b   : > { %p2367_p3 = pnand %p2365_p2, %p2325_p1  ;;  %p2374_p9 = por %p2373_p7, %p2372_p6 }
  0x3d   : > { %p2368_p5 = pneg %p2367_p3 }
  0x3f   : > { %p2375_p12 = pnand %p2374_p9, %p2368_p5 }
  0x41   : > { %2378 = shalt.err (!%p2375_p12)
}
  0x42   : > { %2125 = dma.hbm_to_vmem [thread:$0]  (!%p2560_p13), %s2802_s2, 64, %s2564_s5, [#allocation6]  }
  0x43   : > { %p2813_p0 = scmp.ne.s32.totalorder %s2810_s26, 0 }
  0x44   : > { %p2814_p4 = scmp.ne.s32.totalorder (!%p2813_p0), %s2811_s27, 0 }
  0x45   : > { %183 = sbr.rel (%p2813_p0) target bundleno = 626 (0x272), region = 32 }
  0x4c   : > { %2432 = dma.done.wait (%p2814_p4), [#allocation3], 50176  }
  0x4d   : > { %2434 = vsyncadd (%p2814_p4), [#allocation3], 4294917120 }
  0x4e   : > { %2436 = dma.done.wait (%p2814_p4), [#allocation6], 64  }
  0x4f   : > { %2438 = vsyncadd (%p2814_p4), [#allocation6], 4294967232  ;;  %p214_p1 = scmp.lt.s32.totalorder %s2457_s15, 1  ;;  %v321_v16 = vld [vmem:[#allocation2 + $0x8] sm:$0xff]  ;;  %v323_v20 = vld [vmem:[#allocation2 + $0x18] sm:$0xff]  ;;  %vm958_vm0 = vcmask 130048  }
  0x50   : > { %v325_v17 = vld [vmem:[#allocation2 + $0x28] sm:$0xff]  ;;  %v327_v21 = vld [vmem:[#allocation2 + $0x38] sm:$0xff]  ;;  %v320_v25 = vld [vmem:[#allocation2] sm:$0xff]  ;;  %s211_s27 = sand.u32 1, %s2449_s13   ;;  %s1699_s6 = sshll.u32 %s2457_s15, 9 }
  0x51   : > { %s215_s30 = scalar_select %p214_p1, %s2457_s15, 1  ;;  %v1700_v19 = vpack.c.bf16 %v325_v17, %v321_v16  ;;  %v1896_v23 = vpack.c.bf16 %v327_v21, %v323_v20  ;;  %v324_v26 = vld [vmem:[#allocation2 + $0x20] sm:$0xff]  ;;  %v322_v31 = vld [vmem:[#allocation2 + $0x10] sm:$0xff]  ;;  %v329_v33 = vld [vmem:[#allocation2 + $0x48] sm:$0xff] }
  0x52   : > { %v1702_v30 = vpack.c.bf16 %v324_v26, %v320_v25  ;;  %v326_v32 = vld [vmem:[#allocation2 + $0x30] sm:$0xff]  ;;  %v333_v36 = vld [vmem:[#allocation2 + $0x68] sm:$0xff]  ;;  %v331_v37 = vld [vmem:[#allocation2 + $0x58] sm:$0xff]  ;;  %s1686_s4 = sshll.u32 %s211_s27, 5  ;;  %s2753_s11 = scalar_lea.hbm %s2803_s3, %s1699_s6 }
  0x53   : > { %s2108_s5 = smul.u32 784, %s215_s30  ;;  %1701 = vmatprep.subr.bf16.mxu0 %v1700_v19  ;;  %1897 = vmatprep.subr.bf16.mxu1 %v1896_v23  ;;  %v1898_v35 = vpack.c.bf16 %v326_v32, %v322_v31  ;;  %v335_v38 = vld [vmem:[#allocation2 + $0x78] sm:$0xff]  ;;  %v1704_v39 = vpack.c.bf16 %v333_v36, %v329_v33  ;;  %v328_v43 = vld [vmem:[#allocation2 + $0x40] sm:$0xff]  ;;  %v330_v45 = vld [vmem:[#allocation2 + $0x50] sm:$0xff]  ;;  %s213_s7 = scalar_lea.vmem [#allocation7], %s1686_s4 }
  0x54   : > { %1703 = vmatpush1.bf16.msra.mxu0 %v1702_v30  ;;  %v1900_v40 = vpack.c.bf16 %v335_v38, %v331_v37  ;;  %v332_v44 = vld [vmem:[#allocation2 + $0x60] sm:$0xff]  ;;  %v334_v46 = vld [vmem:[#allocation2 + $0x70] sm:$0xff]  ;;  %v337_v52 = vld [vmem:[#allocation2 + $0x88] sm:$0xff]  ;;  %s1579_s8 = sshll.u32 %s213_s7, 4  ;;  %s1563_s15 = scalar_lea.sflag [#allocation4], %s211_s27  ;;  %s2755_s8 = int_to_ptr.vmem [resolvable:$true] %s1579_s8 }
  0x55   : > { %s2628_s28 = scalar_lea.vmem %s2800_s0, %s2108_s5  ;;  %1899 = vmatpush1.bf16.msra.mxu1 %v1898_v35  ;;  %1705 = vmatprep.subr.bf16.mxu0 %v1704_v39  ;;  %v1706_v50 = vpack.c.bf16 %v332_v44, %v328_v43  ;;  %v1902_v51 = vpack.c.bf16 %v334_v46, %v330_v45  ;;  %v341_v53 = vld [vmem:[#allocation2 + $0xa8] sm:$0xff]  ;;  %v339_v54 = vld [vmem:[#allocation2 + $0x98] sm:$0xff]  ;;  %v336_v61 = vld [vmem:[#allocation2 + $0x80] sm:$0xff]  ;;  %s2379_s18 = scalar_lea.vmem %s2755_s8, 512 }
  0x56   : > { %v222_v0 = vld [vmem:[%s2628_s28] sm:$0xff]  ;;  %v223_v2 = vld [vmem:[%s2628_s28 + $0x8] sm:$0xff]  ;;  %v224_v6 = vld [vmem:[%s2628_s28 + $0x10] sm:$0xff]  ;;  %1901 = vmatprep.subr.bf16.mxu1 %v1900_v40  ;;  %v1708_v56 = vpack.c.bf16 %v341_v53, %v337_v52  ;;  %p2380_p13 = scmp.ne.s32.totalorder %s2755_s8, %s2379_s18  ;;  %p2815_p8 = scmp.ne.s32.totalorder %s2808_s22, 0 }
  0x57   : > { %v238_v1 = vld [vmem:[%s2628_s28 + $0x80] sm:$0xff]  ;;  %v239_v4 = vld [vmem:[%s2628_s28 + $0x88] sm:$0xff]  ;;  %v240_v7 = vld [vmem:[%s2628_s28 + $0x90] sm:$0xff]  ;;  %s2472_s29 = smov [#allocation7]  }
  0x58   : > { %v2188_v3 = vpack.i.bf16 %v222_v0, %v238_v1  ;;  %v2190_v5 = vpack.i.bf16 %v223_v2, %v239_v4  ;;  %v2192_v8 = vpack.i.bf16 %v224_v6, %v240_v7  ;;  %v225_v9 = vld [vmem:[%s2628_s28 + $0x18] sm:$0xff]  ;;  %v226_v11 = vld [vmem:[%s2628_s28 + $0x20] sm:$0xff]  ;;  %v255_v22 = vld [vmem:[%s2628_s28 + $0x108] sm:$0xff]  ;;  %1707 = vmatpush1.bf16.msra.mxu0 %v1706_v50  ;;  %p2381_p10 = pnand %p2380_p13, %p2815_p8  ;;  %s2383_s19 = sshll.u32 %s2472_s29, 4  ;;  %s2384_s19 = int_to_ptr.vmem [resolvable:$false] %s2383_s19 }
  0x59   : > { %v241_v10 = vld [vmem:[%s2628_s28 + $0x98] sm:$0xff]  ;;  %v242_v12 = vld [vmem:[%s2628_s28 + $0xa0] sm:$0xff]  ;;  %v271_v24 = vld [vmem:[%s2628_s28 + $0x188] sm:$0xff]  ;;  %1903 = vmatpush1.bf16.msra.mxu1 %v1902_v51  ;;  %1709 = vmatprep.subr.bf16.mxu0 %v1708_v56  ;;  %s2385_s21 = scalar_lea.vmem %s2384_s19, 1024  ;;  %p2386_p2 = scmp.lt.s32.totalorder %s2755_s8, %s2384_s19 }
  0x5a   : > { %2189 = vxpose.xlu0.b32.start [1/16] (narrow) %v2188_v3, 8  ;;  %v254_v13 = vld [vmem:[%s2628_s28 + $0x100] sm:$0xff]  ;;  %v2194_v14 = vpack.i.bf16 %v225_v9, %v241_v10  ;;  %v2645_v27 = vld [vmem:[%s2628_s28 + $0x28] sm:$0xff]  ;;  %v2227_v29 = vpack.i.bf16 %v255_v22, %v271_v24  ;;  %v2196_v34 = vpack.i.bf16 %v226_v11, %v242_v12  ;;  %v256_v41 = vld [vmem:[%s2628_s28 + $0x110] sm:$0xff]  ;;  %p2382_p11 = pneg %p2381_p10  ;;  %p2387_p3 = scmp.lt.s32.totalorder %s2385_s21, %s2379_s18 }
  0x5b   : > { %v270_v15 = vld [vmem:[%s2628_s28 + $0x180] sm:$0xff]  ;;  %v2648_v28 = vld [vmem:[%s2628_s28 + $0xa8] sm:$0xff]  ;;  %v272_v42 = vld [vmem:[%s2628_s28 + $0x190] sm:$0xff] }
  0x5c   : > { %v2225_v18 = vpack.i.bf16 %v254_v13, %v270_v15  ;;  %v2653_v47 = vld [vmem:[%s2628_s28 + $0x30] sm:$0xff]  ;;  %v2229_v49 = vpack.i.bf16 %v256_v41, %v272_v42  ;;  %v2198_v55 = vpack.i.bf16 %v2645_v27, %v2648_v28  ;;  %v343_v57 = vld [vmem:[#allocation2 + $0xb8] sm:$0xff]  ;;  %v340_v62 = vld [vmem:[#allocation2 + $0xa0] sm:$0xff]  ;;  %p2388_p5 = por %p2387_p3, %p2386_p2 }
  0x5d   : > { %v2656_v48 = vld [vmem:[%s2628_s28 + $0xb0] sm:$0xff]  ;;  %v257_v58 = vld [vmem:[%s2628_s28 + $0x118] sm:$0xff]  ;;  %v1904_v60 = vpack.c.bf16 %v343_v57, %v339_v54  ;;  %v1710_v0 = vpack.c.bf16 %v340_v62, %v336_v61  ;;  %v345_v2 = vld [vmem:[#allocation2 + $0xc8] sm:$0xff] }
  0x5e   : > { %2191 = vxpose.xlu0.b32.cont [2/16] (narrow) %v2190_v5, 8  ;;  %2226 = vxpose.xlu1.b32.start [1/16] (narrow) %v2225_v18, 8  ;;  %v273_v59 = vld [vmem:[%s2628_s28 + $0x198] sm:$0xff]  ;;  %v338_v63 = vld [vmem:[#allocation2 + $0x90] sm:$0xff]  ;;  %v349_v3 = vld [vmem:[#allocation2 + $0xe8] sm:$0xff]  ;;  %v2200_v12 = vpack.i.bf16 %v2653_v47, %v2656_v48  ;;  %p2389_p6 = pnand %p2388_p5, %p2382_p11 }
  0x5f   : > { %v342_v1 = vld [vmem:[#allocation2 + $0xb0] sm:$0xff]  ;;  %v229_v4 = vld [vmem:[%s2628_s28 + $0x38] sm:$0xff]  ;;  %1905 = vmatprep.subr.bf16.mxu1 %v1904_v60  ;;  %v2231_v6 = vpack.i.bf16 %v257_v58, %v273_v59  ;;  %v258_v11 = vld [vmem:[%s2628_s28 + $0x120] sm:$0xff]  ;;  %1711 = vmatpush1.bf16.msra.mxu0 %v1710_v0 }
  0x60   : > { %v245_v5 = vld [vmem:[%s2628_s28 + $0xb8] sm:$0xff]  ;;  %v1906_v7 = vpack.c.bf16 %v342_v1, %v338_v63  ;;  %v344_v15 = vld [vmem:[#allocation2 + $0xc0] sm:$0xff]  ;;  %v346_v18 = vld [vmem:[#allocation2 + $0xd0] sm:$0xff] }
  0x61   : > { %v347_v9 = vld [vmem:[#allocation2 + $0xd8] sm:$0xff]  ;;  %v348_v16 = vld [vmem:[#allocation2 + $0xe0] sm:$0xff]  ;;  %v350_v19 = vld [vmem:[#allocation2 + $0xf0] sm:$0xff]  ;;  %v2202_v33 = vpack.i.bf16 %v229_v4, %v245_v5 }
  0x62   : > { %2193 = vxpose.xlu0.b32.cont [3/16] (narrow) %v2192_v8, 8  ;;  %2228 = vxpose.xlu1.b32.cont [2/16] (narrow) %v2227_v29, 8  ;;  %v1712_v8 = vpack.c.bf16 %v349_v3, %v345_v2  ;;  %v351_v10 = vld [vmem:[#allocation2 + $0xf8] sm:$0xff]  ;;  %v1714_v17 = vpack.c.bf16 %v348_v16, %v344_v15  ;;  %v353_v20 = vld [vmem:[#allocation2 + $0x108] sm:$0xff]  ;;  %v1910_v21 = vpack.c.bf16 %v350_v19, %v346_v18  ;;  %v230_v25 = vld [vmem:[%s2628_s28 + $0x40] sm:$0xff] }
  0x63   : > { %v1908_v13 = vpack.c.bf16 %v351_v10, %v347_v9  ;;  %1907 = vmatpush1.bf16.msra.mxu1 %v1906_v7  ;;  %v357_v22 = vld [vmem:[#allocation2 + $0x128] sm:$0xff]  ;;  %v355_v23 = vld [vmem:[#allocation2 + $0x118] sm:$0xff]  ;;  %v246_v26 = vld [vmem:[%s2628_s28 + $0xc0] sm:$0xff] }
  0x64   : > { %1713 = vmatprep.subr.bf16.mxu0 %v1712_v8  ;;  %v359_v24 = vld [vmem:[#allocation2 + $0x138] sm:$0xff]  ;;  %v1716_v28 = vpack.c.bf16 %v357_v22, %v353_v20  ;;  %v259_v30 = vld [vmem:[%s2628_s28 + $0x128] sm:$0xff]  ;;  %v352_v32 = vld [vmem:[#allocation2 + $0x100] sm:$0xff]  ;;  %v2204_v52 = vpack.i.bf16 %v230_v25, %v246_v26 }
  0x65   : > { %1909 = vmatprep.subr.bf16.mxu1 %v1908_v13  ;;  %v1912_v29 = vpack.c.bf16 %v359_v24, %v355_v23  ;;  %v275_v31 = vld [vmem:[%s2628_s28 + $0x1a8] sm:$0xff]  ;;  %v354_v35 = vld [vmem:[#allocation2 + $0x110] sm:$0xff]  ;;  %1715 = vmatpush1.bf16.msra.mxu0 %v1714_v17  ;;  %v363_v40 = vld [vmem:[#allocation2 + $0x158] sm:$0xff] }
  0x66   : > { %2195 = vxpose.xlu0.b32.cont [4/16] (narrow) %v2194_v14, 8  ;;  %2230 = vxpose.xlu1.b32.cont [3/16] (narrow) %v2229_v49, 8  ;;  %v274_v14 = vld [vmem:[%s2628_s28 + $0x1a0] sm:$0xff]  ;;  %v358_v36 = vld [vmem:[#allocation2 + $0x130] sm:$0xff]  ;;  %v361_v38 = vld [vmem:[#allocation2 + $0x148] sm:$0xff]  ;;  %v2235_v47 = vpack.i.bf16 %v259_v30, %v275_v31 }
  0x67   : > { %v2233_v27 = vpack.i.bf16 %v258_v11, %v274_v14  ;;  %v365_v39 = vld [vmem:[#allocation2 + $0x168] sm:$0xff]  ;;  %1911 = vmatpush1.bf16.msra.mxu1 %v1910_v21  ;;  %1717 = vmatprep.subr.bf16.mxu0 %v1716_v28  ;;  %v1914_v41 = vpack.c.bf16 %v358_v36, %v354_v35  ;;  %v367_v43 = vld [vmem:[#allocation2 + $0x178] sm:$0xff]  ;;  %v260_v44 = vld [vmem:[%s2628_s28 + $0x130] sm:$0xff] }
  0x68   : > { %v1720_v42 = vpack.c.bf16 %v365_v39, %v361_v38  ;;  %v276_v45 = vld [vmem:[%s2628_s28 + $0x1b0] sm:$0xff]  ;;  %v231_v46 = vld [vmem:[%s2628_s28 + $0x48] sm:$0xff]  ;;  %1913 = vmatprep.subr.bf16.mxu1 %v1912_v29  ;;  %v1916_v48 = vpack.c.bf16 %v367_v43, %v363_v40  ;;  %v360_v49 = vld [vmem:[#allocation2 + $0x140] sm:$0xff] }
  0x69   : > { %v364_v50 = vld [vmem:[#allocation2 + $0x160] sm:$0xff]  ;;  %v362_v51 = vld [vmem:[#allocation2 + $0x150] sm:$0xff]  ;;  %v369_v54 = vld [vmem:[#allocation2 + $0x188] sm:$0xff]  ;;  %v2237_v2 = vpack.i.bf16 %v260_v44, %v276_v45 }
  0x6a   : > { %2197 = vxpose.xlu0.b32.cont [5/16] (narrow) %v2196_v34, 8  ;;  %2232 = vxpose.xlu1.b32.cont [4/16] (narrow) %v2231_v6, 8  ;;  %v356_v34 = vld [vmem:[#allocation2 + $0x120] sm:$0xff]  ;;  %v366_v53 = vld [vmem:[#allocation2 + $0x170] sm:$0xff]  ;;  %v247_v56 = vld [vmem:[%s2628_s28 + $0xc8] sm:$0xff]  ;;  %v1722_v57 = vpack.c.bf16 %v364_v50, %v360_v49 }
  0x6b   : > { %v1718_v37 = vpack.c.bf16 %v356_v34, %v352_v32  ;;  %v371_v58 = vld [vmem:[#allocation2 + $0x198] sm:$0xff]  ;;  %1915 = vmatpush1.bf16.msra.mxu1 %v1914_v41  ;;  %v1918_v60 = vpack.c.bf16 %v366_v53, %v362_v51  ;;  %v368_v0 = vld [vmem:[#allocation2 + $0x180] sm:$0xff]  ;;  %v370_v4 = vld [vmem:[#allocation2 + $0x190] sm:$0xff]  ;;  %v2206_v7 = vpack.i.bf16 %v231_v46, %v247_v56 }
  0x6c   : > { %v375_v59 = vld [vmem:[#allocation2 + $0x1b8] sm:$0xff]  ;;  %v372_v1 = vld [vmem:[#allocation2 + $0x1a0] sm:$0xff]  ;;  %1917 = vmatprep.subr.bf16.mxu1 %v1916_v48  ;;  %v374_v5 = vld [vmem:[#allocation2 + $0x1b0] sm:$0xff] }
  0x6d   : > { %1719 = vmatpush1.bf16.msra.mxu0 %v1718_v37  ;;  %v261_v62 = vld [vmem:[%s2628_s28 + $0x138] sm:$0xff]  ;;  %v1920_v3 = vpack.c.bf16 %v375_v59, %v371_v58  ;;  %v377_v6 = vld [vmem:[#allocation2 + $0x1c8] sm:$0xff]  ;;  %v232_v11 = vld [vmem:[%s2628_s28 + $0x50] sm:$0xff]  ;;  %v1726_v13 = vpack.c.bf16 %v372_v1, %v368_v0  ;;  %v1922_v14 = vpack.c.bf16 %v374_v5, %v370_v4 }
  0x6e   : > { %2199 = vxpose.xlu0.b32.cont [6/16] (narrow) %v2198_v55, 8  ;;  %2234 = vxpose.xlu1.b32.cont [5/16] (narrow) %v2233_v27, 8  ;;  %v373_v55 = vld [vmem:[#allocation2 + $0x1a8] sm:$0xff]  ;;  %v277_v63 = vld [vmem:[%s2628_s28 + $0x1b8] sm:$0xff]  ;;  %v262_v16 = vld [vmem:[%s2628_s28 + $0x140] sm:$0xff] }
  0x6f   : > { %1721 = vmatprep.subr.bf16.mxu0 %v1720_v42  ;;  %v1724_v61 = vpack.c.bf16 %v373_v55, %v369_v54  ;;  %v381_v8 = vld [vmem:[#allocation2 + $0x1e8] sm:$0xff]  ;;  %v379_v9 = vld [vmem:[#allocation2 + $0x1d8] sm:$0xff]  ;;  %1919 = vmatpush1.bf16.msra.mxu1 %v1918_v60  ;;  %v376_v17 = vld [vmem:[#allocation2 + $0x1c0] sm:$0xff]  ;;  %v2239_v20 = vpack.i.bf16 %v261_v62, %v277_v63 }
  0x70   : > { %v383_v10 = vld [vmem:[#allocation2 + $0x1f8] sm:$0xff]  ;;  %v1728_v15 = vpack.c.bf16 %v381_v8, %v377_v6  ;;  %v380_v18 = vld [vmem:[#allocation2 + $0x1e0] sm:$0xff]  ;;  %v378_v19 = vld [vmem:[#allocation2 + $0x1d0] sm:$0xff]  ;;  %1921 = vmatprep.subr.bf16.mxu1 %v1920_v3 }
  0x71   : > { %1723 = vmatpush1.bf16.msra.mxu0 %v1722_v57  ;;  %v1924_v21 = vpack.c.bf16 %v383_v10, %v379_v9  ;;  %v382_v22 = vld [vmem:[#allocation2 + $0x1f0] sm:$0xff]  ;;  %v385_v23 = vld [vmem:[#allocation2 + $0x208] sm:$0xff]  ;;  %v278_v26 = vld [vmem:[%s2628_s28 + $0x1c0] sm:$0xff]  ;;  %v1730_v31 = vpack.c.bf16 %v380_v18, %v376_v17 }
  0x72   : > { %2201 = vxpose.xlu0.b32.cont [7/16] (narrow) %v2200_v12, 8  ;;  %2236 = vxpose.xlu1.b32.cont [6/16] (narrow) %v2235_v47, 8  ;;  %v248_v12 = vld [vmem:[%s2628_s28 + $0xd0] sm:$0xff]  ;;  %v389_v24 = vld [vmem:[#allocation2 + $0x228] sm:$0xff]  ;;  %v387_v27 = vld [vmem:[#allocation2 + $0x218] sm:$0xff]  ;;  %v1926_v32 = vpack.c.bf16 %v382_v22, %v378_v19  ;;  %v2241_v38 = vpack.i.bf16 %v262_v16, %v278_v26 }
  0x73   : > { %1725 = vmatprep.subr.bf16.mxu0 %v1724_v61  ;;  %v2208_v25 = vpack.i.bf16 %v232_v11, %v248_v12  ;;  %v391_v28 = vld [vmem:[#allocation2 + $0x238] sm:$0xff]  ;;  %1923 = vmatpush1.bf16.msra.mxu1 %v1922_v14  ;;  %v263_v34 = vld [vmem:[%s2628_s28 + $0x148] sm:$0xff]  ;;  %v384_v35 = vld [vmem:[#allocation2 + $0x200] sm:$0xff] }
  0x74   : > { %v233_v29 = vld [vmem:[%s2628_s28 + $0x58] sm:$0xff]  ;;  %v388_v36 = vld [vmem:[#allocation2 + $0x220] sm:$0xff]  ;;  %v386_v37 = vld [vmem:[#allocation2 + $0x210] sm:$0xff]  ;;  %1925 = vmatprep.subr.bf16.mxu1 %v1924_v21  ;;  %v1928_v39 = vpack.c.bf16 %v391_v28, %v387_v27 }
  0x75   : > { %v249_v30 = vld [vmem:[%s2628_s28 + $0xd8] sm:$0xff]  ;;  %1727 = vmatpush1.bf16.msra.mxu0 %v1726_v13  ;;  %v390_v40 = vld [vmem:[#allocation2 + $0x230] sm:$0xff]  ;;  %v393_v41 = vld [vmem:[#allocation2 + $0x248] sm:$0xff]  ;;  %v1734_v49 = vpack.c.bf16 %v388_v36, %v384_v35 }
  0x76   : > { %2203 = vxpose.xlu0.b32.cont [8/16] (narrow) %v2202_v33, 8  ;;  %2238 = vxpose.xlu1.b32.cont [7/16] (narrow) %v2237_v2, 8  ;;  %v1732_v33 = vpack.c.bf16 %v389_v24, %v385_v23  ;;  %v397_v42 = vld [vmem:[#allocation2 + $0x268] sm:$0xff]  ;;  %v2210_v43 = vpack.i.bf16 %v233_v29, %v249_v30  ;;  %v395_v45 = vld [vmem:[#allocation2 + $0x258] sm:$0xff]  ;;  %v234_v47 = vld [vmem:[%s2628_s28 + $0x60] sm:$0xff]  ;;  %v1930_v50 = vpack.c.bf16 %v390_v40, %v386_v37 }
  0x77   : > { %1729 = vmatprep.subr.bf16.mxu0 %v1728_v15  ;;  %v279_v44 = vld [vmem:[%s2628_s28 + $0x1c8] sm:$0xff]  ;;  %v399_v46 = vld [vmem:[#allocation2 + $0x278] sm:$0xff]  ;;  %v250_v48 = vld [vmem:[%s2628_s28 + $0xe0] sm:$0xff]  ;;  %1927 = vmatpush1.bf16.msra.mxu1 %v1926_v32  ;;  %v1736_v51 = vpack.c.bf16 %v397_v42, %v393_v41 }
  0x78   : > { %v392_v53 = vld [vmem:[#allocation2 + $0x240] sm:$0xff]  ;;  %v394_v55 = vld [vmem:[#allocation2 + $0x250] sm:$0xff]  ;;  %1929 = vmatprep.subr.bf16.mxu1 %v1928_v39  ;;  %v2243_v56 = vpack.i.bf16 %v263_v34, %v279_v44  ;;  %v1932_v57 = vpack.c.bf16 %v399_v46, %v395_v45  ;;  %v401_v59 = vld [vmem:[#allocation2 + $0x288] sm:$0xff]  ;;  %v2212_v61 = vpack.i.bf16 %v234_v47, %v250_v48 }
  0x79   : > { %1731 = vmatpush1.bf16.msra.mxu0 %v1730_v31  ;;  %v396_v54 = vld [vmem:[#allocation2 + $0x260] sm:$0xff]  ;;  %v398_v58 = vld [vmem:[#allocation2 + $0x270] sm:$0xff]  ;;  %v405_v60 = vld [vmem:[#allocation2 + $0x2a8] sm:$0xff] }
  0x7a   : > { %2205 = vxpose.xlu0.b32.cont [9/16] (narrow) %v2204_v52, 8  ;;  %2240 = vxpose.xlu1.b32.cont [8/16] (narrow) %v2239_v20, 8  ;;  %v264_v52 = vld [vmem:[%s2628_s28 + $0x150] sm:$0xff]  ;;  %v403_v63 = vld [vmem:[#allocation2 + $0x298] sm:$0xff]  ;;  %v235_v1 = vld [vmem:[%s2628_s28 + $0x68] sm:$0xff]  ;;  %v1738_v3 = vpack.c.bf16 %v396_v54, %v392_v53  ;;  %v1934_v4 = vpack.c.bf16 %v398_v58, %v394_v55  ;;  %v1740_v5 = vpack.c.bf16 %v405_v60, %v401_v59 }
  0x7b   : > { %1733 = vmatprep.subr.bf16.mxu0 %v1732_v33  ;;  %v280_v62 = vld [vmem:[%s2628_s28 + $0x1d0] sm:$0xff]  ;;  %v407_v0 = vld [vmem:[#allocation2 + $0x2b8] sm:$0xff]  ;;  %v251_v2 = vld [vmem:[%s2628_s28 + $0xe8] sm:$0xff]  ;;  %1931 = vmatpush1.bf16.msra.mxu1 %v1930_v50 }
  0x7c   : > { %v265_v6 = vld [vmem:[%s2628_s28 + $0x158] sm:$0xff]  ;;  %v404_v8 = vld [vmem:[#allocation2 + $0x2a0] sm:$0xff]  ;;  %v402_v9 = vld [vmem:[#allocation2 + $0x290] sm:$0xff]  ;;  %1933 = vmatprep.subr.bf16.mxu1 %v1932_v57  ;;  %v2245_v10 = vpack.i.bf16 %v264_v52, %v280_v62  ;;  %v1936_v11 = vpack.c.bf16 %v407_v0, %v403_v63  ;;  %v2214_v15 = vpack.i.bf16 %v235_v1, %v251_v2 }
  0x7d   : > { %1735 = vmatpush1.bf16.msra.mxu0 %v1734_v49  ;;  %v406_v12 = vld [vmem:[#allocation2 + $0x2b0] sm:$0xff]  ;;  %v409_v13 = vld [vmem:[#allocation2 + $0x2c8] sm:$0xff]  ;;  %v281_v16 = vld [vmem:[%s2628_s28 + $0x1d8] sm:$0xff] }
  0x7e   : > { %2207 = vxpose.xlu0.b32.cont [10/16] (narrow) %v2206_v7, 8  ;;  %2242 = vxpose.xlu1.b32.cont [9/16] (narrow) %v2241_v38, 8  ;;  %v400_v7 = vld [vmem:[#allocation2 + $0x280] sm:$0xff]  ;;  %v413_v14 = vld [vmem:[#allocation2 + $0x2e8] sm:$0xff]  ;;  %v411_v17 = vld [vmem:[#allocation2 + $0x2d8] sm:$0xff]  ;;  %v1938_v22 = vpack.c.bf16 %v406_v12, %v402_v9  ;;  %v2247_v28 = vpack.i.bf16 %v265_v6, %v281_v16 }
  0x7f   : > { %1737 = vmatprep.subr.bf16.mxu0 %v1736_v51  ;;  %v415_v18 = vld [vmem:[#allocation2 + $0x2f8] sm:$0xff]  ;;  %v236_v19 = vld [vmem:[%s2628_s28 + $0x70] sm:$0xff]  ;;  %v1742_v21 = vpack.c.bf16 %v404_v8, %v400_v7  ;;  %1935 = vmatpush1.bf16.msra.mxu1 %v1934_v4  ;;  %v1744_v23 = vpack.c.bf16 %v413_v14, %v409_v13  ;;  %v266_v24 = vld [vmem:[%s2628_s28 + $0x160] sm:$0xff] }
  0x80   : > { %v252_v20 = vld [vmem:[%s2628_s28 + $0xf0] sm:$0xff]  ;;  %v412_v26 = vld [vmem:[#allocation2 + $0x2e0] sm:$0xff]  ;;  %1937 = vmatprep.subr.bf16.mxu1 %v1936_v11  ;;  %v1940_v29 = vpack.c.bf16 %v415_v18, %v411_v17  ;;  %v417_v31 = vld [vmem:[#allocation2 + $0x308] sm:$0xff] }
  0x81   : > { %1739 = vmatpush1.bf16.msra.mxu0 %v1738_v3  ;;  %v410_v27 = vld [vmem:[#allocation2 + $0x2d0] sm:$0xff]  ;;  %v421_v32 = vld [vmem:[#allocation2 + $0x328] sm:$0xff]  ;;  %v2216_v33 = vpack.i.bf16 %v236_v19, %v252_v20  ;;  %v282_v34 = vld [vmem:[%s2628_s28 + $0x1e0] sm:$0xff] }
  0x82   : > { %2209 = vxpose.xlu0.b32.cont [11/16] (narrow) %v2208_v25, 8  ;;  %2244 = vxpose.xlu1.b32.cont [10/16] (narrow) %v2243_v56, 8  ;;  %v408_v25 = vld [vmem:[#allocation2 + $0x2c0] sm:$0xff]  ;;  %v414_v30 = vld [vmem:[#allocation2 + $0x2f0] sm:$0xff]  ;;  %v419_v35 = vld [vmem:[#allocation2 + $0x318] sm:$0xff]  ;;  %v1748_v41 = vpack.c.bf16 %v421_v32, %v417_v31  ;;  %v2249_v46 = vpack.i.bf16 %v266_v24, %v282_v34 }
  0x83   : > { %1741 = vmatprep.subr.bf16.mxu0 %v1740_v5  ;;  %v423_v36 = vld [vmem:[#allocation2 + $0x338] sm:$0xff]  ;;  %v1746_v39 = vpack.c.bf16 %v412_v26, %v408_v25  ;;  %1939 = vmatpush1.bf16.msra.mxu1 %v1938_v22  ;;  %v1942_v40 = vpack.c.bf16 %v414_v30, %v410_v27  ;;  %v267_v42 = vld [vmem:[%s2628_s28 + $0x168] sm:$0xff]  ;;  %v420_v44 = vld [vmem:[#allocation2 + $0x320] sm:$0xff] }
  0x84   : > { %v237_v37 = vld [vmem:[%s2628_s28 + $0x78] sm:$0xff]  ;;  %v418_v45 = vld [vmem:[#allocation2 + $0x310] sm:$0xff]  ;;  %1941 = vmatprep.subr.bf16.mxu1 %v1940_v29  ;;  %v1944_v47 = vpack.c.bf16 %v423_v36, %v419_v35  ;;  %v425_v49 = vld [vmem:[#allocation2 + $0x348] sm:$0xff] }
  0x85   : > { %v253_v38 = vld [vmem:[%s2628_s28 + $0xf8] sm:$0xff]  ;;  %1743 = vmatpush1.bf16.msra.mxu0 %v1742_v21  ;;  %v422_v48 = vld [vmem:[#allocation2 + $0x330] sm:$0xff]  ;;  %v429_v50 = vld [vmem:[#allocation2 + $0x368] sm:$0xff] }
  0x86   : > { %2211 = vxpose.xlu0.b32.cont [12/16] (narrow) %v2210_v43, 8  ;;  %2246 = vxpose.xlu1.b32.cont [11/16] (narrow) %v2245_v10, 8  ;;  %v416_v43 = vld [vmem:[#allocation2 + $0x300] sm:$0xff]  ;;  %v2218_v51 = vpack.i.bf16 %v237_v37, %v253_v38  ;;  %v283_v52 = vld [vmem:[%s2628_s28 + $0x1e8] sm:$0xff]  ;;  %v427_v53 = vld [vmem:[#allocation2 + $0x358] sm:$0xff]  ;;  %v1946_v57 = vpack.c.bf16 %v422_v48, %v418_v45  ;;  %v1752_v58 = vpack.c.bf16 %v429_v50, %v425_v49 }
  0x87   : > { %1745 = vmatprep.subr.bf16.mxu0 %v1744_v23  ;;  %v431_v54 = vld [vmem:[#allocation2 + $0x378] sm:$0xff]  ;;  %v1750_v55 = vpack.c.bf16 %v420_v44, %v416_v43  ;;  %v424_v56 = vld [vmem:[#allocation2 + $0x340] sm:$0xff]  ;;  %1943 = vmatpush1.bf16.msra.mxu1 %v1942_v40  ;;  %v268_v59 = vld [vmem:[%s2628_s28 + $0x170] sm:$0xff]  ;;  %v2251_v0 = vpack.i.bf16 %v267_v42, %v283_v52 }
  0x88   : > { %v284_v60 = vld [vmem:[%s2628_s28 + $0x1f0] sm:$0xff]  ;;  %1945 = vmatprep.subr.bf16.mxu1 %v1944_v47  ;;  %v1948_v1 = vpack.c.bf16 %v431_v54, %v427_v53  ;;  %v433_v2 = vld [vmem:[#allocation2 + $0x388] sm:$0xff]  ;;  %v286_v4 = vld [vmem:[%s2628_s28 + $0x200] sm:$0xff] }
  0x89   : > { %1747 = vmatpush1.bf16.msra.mxu0 %v1746_v39  ;;  %v426_v62 = vld [vmem:[#allocation2 + $0x350] sm:$0xff]  ;;  %v437_v3 = vld [vmem:[#allocation2 + $0x3a8] sm:$0xff]  ;;  %v435_v5 = vld [vmem:[#allocation2 + $0x398] sm:$0xff]  ;;  %v2253_v18 = vpack.i.bf16 %v268_v59, %v284_v60 }
  0x8a   : > { %2213 = vxpose.xlu0.b32.cont [13/16] (narrow) %v2212_v61, 8  ;;  %2248 = vxpose.xlu1.b32.cont [12/16] (narrow) %v2247_v28, 8  ;;  %v428_v61 = vld [vmem:[#allocation2 + $0x360] sm:$0xff]  ;;  %v430_v63 = vld [vmem:[#allocation2 + $0x370] sm:$0xff]  ;;  %v439_v6 = vld [vmem:[#allocation2 + $0x3b8] sm:$0xff]  ;;  %v1756_v13 = vpack.c.bf16 %v437_v3, %v433_v2 }
  0x8b   : > { %1749 = vmatprep.subr.bf16.mxu0 %v1748_v41  ;;  %v302_v7 = vld [vmem:[%s2628_s28 + $0x280] sm:$0xff]  ;;  %v1754_v8 = vpack.c.bf16 %v428_v61, %v424_v56  ;;  %1947 = vmatpush1.bf16.msra.mxu1 %v1946_v57  ;;  %v1950_v12 = vpack.c.bf16 %v430_v63, %v426_v62  ;;  %v269_v14 = vld [vmem:[%s2628_s28 + $0x178] sm:$0xff]  ;;  %v438_v16 = vld [vmem:[#allocation2 + $0x3b0] sm:$0xff]  ;;  %v1952_v19 = vpack.c.bf16 %v439_v6, %v435_v5 }
  0x8c   : > { %v432_v9 = vld [vmem:[#allocation2 + $0x380] sm:$0xff]  ;;  %v2262_v11 = vpack.i.bf16 %v286_v4, %v302_v7  ;;  %v441_v17 = vld [vmem:[#allocation2 + $0x3c8] sm:$0xff]  ;;  %1949 = vmatprep.subr.bf16.mxu1 %v1948_v1  ;;  %v285_v23 = vld [vmem:[%s2628_s28 + $0x1f8] sm:$0xff] }
  0x8d   : > { %1751 = vmatpush1.bf16.msra.mxu0 %v1750_v55  ;;  %v436_v10 = vld [vmem:[#allocation2 + $0x3a0] sm:$0xff]  ;;  %v445_v20 = vld [vmem:[#allocation2 + $0x3e8] sm:$0xff]  ;;  %v443_v24 = vld [vmem:[#allocation2 + $0x3d8] sm:$0xff]  ;;  %v2255_v35 = vpack.i.bf16 %v269_v14, %v285_v23 }
  0x8e   : > { %2215 = vxpose.xlu0.b32.cont [14/16] (narrow) %v2214_v15, 8  ;;  %2250 = vxpose.xlu1.b32.cont [13/16] (narrow) %v2249_v46, 8  ;;  %v434_v15 = vld [vmem:[#allocation2 + $0x390] sm:$0xff]  ;;  %v287_v21 = vld [vmem:[%s2628_s28 + $0x208] sm:$0xff]  ;;  %v447_v25 = vld [vmem:[#allocation2 + $0x3f8] sm:$0xff]  ;;  %v1758_v27 = vpack.c.bf16 %v436_v10, %v432_v9  ;;  %v1760_v31 = vpack.c.bf16 %v445_v20, %v441_v17 }
  0x8f   : > { %1753 = vmatprep.subr.bf16.mxu0 %v1752_v58  ;;  %v303_v22 = vld [vmem:[%s2628_s28 + $0x288] sm:$0xff]  ;;  %v288_v28 = vld [vmem:[%s2628_s28 + $0x210] sm:$0xff]  ;;  %1951 = vmatpush1.bf16.msra.mxu1 %v1950_v12  ;;  %v1954_v30 = vpack.c.bf16 %v438_v16, %v434_v15  ;;  %v440_v32 = vld [vmem:[#allocation2 + $0x3c0] sm:$0xff]  ;;  %v1956_v36 = vpack.c.bf16 %v447_v25, %v443_v24 }
  0x90   : > { %v2264_v26 = vpack.i.bf16 %v287_v21, %v303_v22  ;;  %v304_v29 = vld [vmem:[%s2628_s28 + $0x290] sm:$0xff]  ;;  %1953 = vmatprep.subr.bf16.mxu1 %v1952_v19  ;;  %v449_v38 = vld [vmem:[#allocation2 + $0x408] sm:$0xff]  ;;  %v451_v40 = vld [vmem:[#allocation2 + $0x418] sm:$0xff] }
  0x91   : > { %1755 = vmatpush1.bf16.msra.mxu0 %v1754_v8  ;;  %v442_v34 = vld [vmem:[#allocation2 + $0x3d0] sm:$0xff]  ;;  %v453_v39 = vld [vmem:[#allocation2 + $0x428] sm:$0xff]  ;;  %v455_v41 = vld [vmem:[#allocation2 + $0x438] sm:$0xff]  ;;  %v2266_v42 = vpack.i.bf16 %v288_v28, %v304_v29 }
  0x92   : > { %2217 = vxpose.xlu0.b32.cont [15/16] (narrow) %v2216_v33, 8  ;;  %2252 = vxpose.xlu1.b32.cont [14/16] (narrow) %v2251_v0, 8  ;;  %v444_v33 = vld [vmem:[#allocation2 + $0x3e0] sm:$0xff]  ;;  %v446_v37 = vld [vmem:[#allocation2 + $0x3f0] sm:$0xff]  ;;  %v289_v44 = vld [vmem:[%s2628_s28 + $0x218] sm:$0xff]  ;;  %v1764_v47 = vpack.c.bf16 %v453_v39, %v449_v38  ;;  %v1960_v48 = vpack.c.bf16 %v455_v41, %v451_v40 }
  0x93   : > { %1757 = vmatprep.subr.bf16.mxu0 %v1756_v13  ;;  %v1762_v43 = vpack.c.bf16 %v444_v33, %v440_v32  ;;  %v305_v45 = vld [vmem:[%s2628_s28 + $0x298] sm:$0xff]  ;;  %1955 = vmatpush1.bf16.msra.mxu1 %v1954_v30  ;;  %v1958_v46 = vpack.c.bf16 %v446_v37, %v442_v34  ;;  %v318_v49 = vld [vmem:[%s2628_s28 + $0x300] sm:$0xff]  ;;  %v319_v53 = vld [vmem:[%s2628_s28 + $0x308] sm:$0xff] }
  0x94   : > { %1957 = vmatprep.subr.bf16.mxu1 %v1956_v36  ;;  %v2268_v50 = vpack.i.bf16 %v289_v44, %v305_v45  ;;  %v306_v52 = vld [vmem:[%s2628_s28 + $0x2a0] sm:$0xff]  ;;  %v291_v55 = vld [vmem:[%s2628_s28 + $0x228] sm:$0xff]  ;;  %v292_v58 = vld [vmem:[%s2628_s28 + $0x230] sm:$0xff] }
  0x95   : > { %1759 = vmatpush1.bf16.msra.mxu0 %v1758_v27  ;;  %v307_v56 = vld [vmem:[%s2628_s28 + $0x2a8] sm:$0xff]  ;;  %v308_v59 = vld [vmem:[%s2628_s28 + $0x2b0] sm:$0xff]  ;;  %v293_v61 = vld [vmem:[%s2628_s28 + $0x238] sm:$0xff] }
  0x96   : > { %2219 = vxpose.xlu0.b32.end [16/16] (narrow) %v2218_v51, 8  ;;  %2254 = vxpose.xlu1.b32.cont [15/16] (narrow) %v2253_v18, 8  ;;  %v290_v51 = vld [vmem:[%s2628_s28 + $0x220] sm:$0xff]  ;;  %v2272_v57 = vpack.i.bf16 %v291_v55, %v307_v56  ;;  %v2274_v60 = vpack.i.bf16 %v292_v58, %v308_v59  ;;  %v309_v62 = vld [vmem:[%s2628_s28 + $0x2b8] sm:$0xff]  ;;  %v295_v3 = vld [vmem:[%s2628_s28 + $0x248] sm:$0xff] }
  0x97   : > { %1761 = vmatprep.subr.bf16.mxu0 %v1760_v31  ;;  %1959 = vmatpush1.bf16.msra.mxu1 %v1958_v46  ;;  %v2270_v54 = vpack.i.bf16 %v290_v51, %v306_v52  ;;  %v2276_v63 = vpack.i.bf16 %v293_v61, %v309_v62  ;;  %v294_v0 = vld [vmem:[%s2628_s28 + $0x240] sm:$0xff]  ;;  %v311_v4 = vld [vmem:[%s2628_s28 + $0x2c8] sm:$0xff]  ;;  %v296_v6 = vld [vmem:[%s2628_s28 + $0x250] sm:$0xff] }
  0x98   : > { %1961 = vmatprep.subr.bf16.mxu1 %v1960_v48  ;;  %v310_v1 = vld [vmem:[%s2628_s28 + $0x2c0] sm:$0xff]  ;;  %v2280_v5 = vpack.i.bf16 %v295_v3, %v311_v4  ;;  %v312_v7 = vld [vmem:[%s2628_s28 + $0x2d0] sm:$0xff]  ;;  %v297_v9 = vld [vmem:[%s2628_s28 + $0x258] sm:$0xff] }
  0x99   : > { %1763 = vmatpush1.bf16.msra.mxu0 %v1762_v43  ;;  %v2278_v2 = vpack.i.bf16 %v294_v0, %v310_v1  ;;  %v2282_v8 = vpack.i.bf16 %v296_v6, %v312_v7  ;;  %v313_v10 = vld [vmem:[%s2628_s28 + $0x2d8] sm:$0xff]  ;;  %v298_v12 = vld [vmem:[%s2628_s28 + $0x260] sm:$0xff]  ;;  %v299_v15 = vld [vmem:[%s2628_s28 + $0x268] sm:$0xff] }
  0x9a   : > { %2263 = vxpose.xlu0.b32.start [1/16] (narrow) %v2262_v11, 8  ;;  %2256 = vxpose.xlu1.b32.end [16/16] (narrow) %v2255_v35, 8  ;;  %v2284_v11 = vpack.i.bf16 %v297_v9, %v313_v10  ;;  %v314_v13 = vld [vmem:[%s2628_s28 + $0x2e0] sm:$0xff]  ;;  %v315_v16 = vld [vmem:[%s2628_s28 + $0x2e8] sm:$0xff]  ;;  %v300_v18 = vld [vmem:[%s2628_s28 + $0x270] sm:$0xff] }
  0x9b   : > { %1765 = vmatprep.subr.bf16.mxu0 %v1764_v47  ;;  %v2286_v14 = vpack.i.bf16 %v298_v12, %v314_v13  ;;  %v2288_v17 = vpack.i.bf16 %v299_v15, %v315_v16  ;;  %v316_v19 = vld [vmem:[%s2628_s28 + $0x2f0] sm:$0xff]  ;;  %v301_v21 = vld [vmem:[%s2628_s28 + $0x278] sm:$0xff]  ;;  %v448_v24 = vld [vmem:[#allocation2 + $0x400] sm:$0xff] }
  0x9c   : > { %v2290_v20 = vpack.i.bf16 %v300_v18, %v316_v19  ;;  %v317_v22 = vld [vmem:[%s2628_s28 + $0x2f8] sm:$0xff]  ;;  %v452_v25 = vld [vmem:[#allocation2 + $0x420] sm:$0xff]  ;;  %v454_v27 = vld [vmem:[#allocation2 + $0x430] sm:$0xff] }
  0x9d   : > { %v2292_v23 = vpack.i.bf16 %v301_v21, %v317_v22  ;;  %v457_v28 = vld [vmem:[#allocation2 + $0x448] sm:$0xff]  ;;  %v459_v30 = vld [vmem:[#allocation2 + $0x458] sm:$0xff]  ;;  %v1766_v33 = vpack.c.bf16 %v452_v25, %v448_v24  ;;  %v456_v37 = vld [vmem:[#allocation2 + $0x440] sm:$0xff] }
  0x9e   : > { %2265 = vxpose.xlu0.b32.cont [2/16] (narrow) %v2264_v26, 8  ;;  %926 = vxpose.xlu1.b32.start [1/2] (short) (narrow) %v318_v49, 8  ;;  %v450_v26 = vld [vmem:[#allocation2 + $0x410] sm:$0xff]  ;;  %v461_v29 = vld [vmem:[#allocation2 + $0x468] sm:$0xff]  ;;  %v463_v31 = vld [vmem:[#allocation2 + $0x478] sm:$0xff] }
  0x9f   : > { %v1962_v34 = vpack.c.bf16 %v454_v27, %v450_v26  ;;  %v460_v38 = vld [vmem:[#allocation2 + $0x460] sm:$0xff]  ;;  %v1768_v39 = vpack.c.bf16 %v461_v29, %v457_v28  ;;  %v1964_v40 = vpack.c.bf16 %v463_v31, %v459_v30  ;;  %v458_v41 = vld [vmem:[#allocation2 + $0x450] sm:$0xff]  ;;  %v465_v43 = vld [vmem:[#allocation2 + $0x488] sm:$0xff] }
  0xa0   : > { %v469_v44 = vld [vmem:[#allocation2 + $0x4a8] sm:$0xff]  ;;  %v467_v45 = vld [vmem:[#allocation2 + $0x498] sm:$0xff]  ;;  %v1770_v47 = vpack.c.bf16 %v460_v38, %v456_v37  ;;  %v464_v49 = vld [vmem:[#allocation2 + $0x480] sm:$0xff] }
  0xa1   : > { %v471_v46 = vld [vmem:[#allocation2 + $0x4b8] sm:$0xff]  ;;  %v1772_v51 = vpack.c.bf16 %v469_v44, %v465_v43  ;;  %v473_v55 = vld [vmem:[#allocation2 + $0x4c8] sm:$0xff]  ;;  %v472_v61 = vld [vmem:[#allocation2 + $0x4c0] sm:$0xff] }
  0xa2   : > { %2267 = vxpose.xlu0.b32.cont [3/16] (narrow) %v2266_v42, 8  ;;  %927 = vxpose.xlu1.b32.end [2/2] (short) (narrow) %v319_v53, 8  ;;  %v462_v42 = vld [vmem:[#allocation2 + $0x470] sm:$0xff]  ;;  %v1968_v52 = vpack.c.bf16 %v471_v46, %v467_v45  ;;  %v477_v56 = vld [vmem:[#allocation2 + $0x4e8] sm:$0xff]  ;;  %v479_v58 = vld [vmem:[#allocation2 + $0x4f8] sm:$0xff] }
  0xa3   : > { %v1966_v48 = vpack.c.bf16 %v462_v42, %v458_v41  ;;  %v466_v53 = vld [vmem:[#allocation2 + $0x490] sm:$0xff]  ;;  %v476_v62 = vld [vmem:[#allocation2 + $0x4e0] sm:$0xff]  ;;  %v481_v3 = vld [vmem:[#allocation2 + $0x508] sm:$0xff] }
  0xa4   : > { %v474_v1 = vld [vmem:[#allocation2 + $0x4d0] sm:$0xff]  ;;  %v485_v4 = vld [vmem:[#allocation2 + $0x528] sm:$0xff]  ;;  %v487_v6 = vld [vmem:[#allocation2 + $0x538] sm:$0xff]  ;;  %v1778_v9 = vpack.c.bf16 %v476_v62, %v472_v61 }
  0xa5   : > { %v484_v12 = vld [vmem:[#allocation2 + $0x520] sm:$0xff]  ;;  %v1780_v13 = vpack.c.bf16 %v485_v4, %v481_v3  ;;  %v482_v15 = vld [vmem:[#allocation2 + $0x510] sm:$0xff]  ;;  %v493_v18 = vld [vmem:[#allocation2 + $0x568] sm:$0xff] }
  0xa6   : > { %2269 = vxpose.xlu0.b32.cont [4/16] (narrow) %v2268_v50, 8  ;;  %v468_v50 = vld [vmem:[#allocation2 + $0x4a0] sm:$0xff]  ;;  %v486_v16 = vld [vmem:[#allocation2 + $0x530] sm:$0xff]  ;;  %v491_v19 = vld [vmem:[#allocation2 + $0x558] sm:$0xff] }
  0xa7   : > { %v1774_v59 = vpack.c.bf16 %v468_v50, %v464_v49  ;;  %v1978_v22 = vpack.c.bf16 %v486_v16, %v482_v15  ;;  %v492_v24 = vld [vmem:[#allocation2 + $0x560] sm:$0xff]  ;;  %v490_v27 = vld [vmem:[#allocation2 + $0x550] sm:$0xff]  ;;  %v497_v29 = vld [vmem:[#allocation2 + $0x588] sm:$0xff] }
  0xa8   : > { %v494_v28 = vld [vmem:[#allocation2 + $0x570] sm:$0xff]  ;;  %v501_v30 = vld [vmem:[#allocation2 + $0x5a8] sm:$0xff]  ;;  %v499_v31 = vld [vmem:[#allocation2 + $0x598] sm:$0xff] }
  0xa9   : > { %v1788_v37 = vpack.c.bf16 %v501_v30, %v497_v29  ;;  %v505_v41 = vld [vmem:[#allocation2 + $0x5c8] sm:$0xff]  ;;  %v507_v43 = vld [vmem:[#allocation2 + $0x5d8] sm:$0xff] }
  0xaa   : > { %2271 = vxpose.xlu0.b32.cont [5/16] (narrow) %v2270_v54, 8  ;;  %v470_v54 = vld [vmem:[#allocation2 + $0x4b0] sm:$0xff]  ;;  %v509_v42 = vld [vmem:[#allocation2 + $0x5e8] sm:$0xff]  ;;  %v511_v44 = vld [vmem:[#allocation2 + $0x5f8] sm:$0xff] }
  0xab   : > { %v1792_v49 = vpack.c.bf16 %v509_v42, %v505_v41  ;;  %v1988_v50 = vpack.c.bf16 %v511_v44, %v507_v43  ;;  %v523_v3 = vld [vmem:[#allocation2 + $0x658] sm:$0xff]  ;;  %v533_v15 = vld [vmem:[#allocation2 + $0x6a8] sm:$0xff]  ;;  %v544_v44 = vld [vmem:[#allocation2 + $0x700] sm:$0xff] }
  0xac   : > { %v527_v4 = vld [vmem:[#allocation2 + $0x678] sm:$0xff] }
  0xad   : > { %v531_v16 = vld [vmem:[#allocation2 + $0x698] sm:$0xff] }
  0xae   : > { %2273 = vxpose.xlu0.b32.cont [6/16] (narrow) %v2272_v57, 8  ;;  %v475_v57 = vld [vmem:[#allocation2 + $0x4d8] sm:$0xff] }
  0xaf   : > { %v1972_v0 = vpack.c.bf16 %v479_v58, %v475_v57  ;;  %v543_v29 = vld [vmem:[#allocation2 + $0x6f8] sm:$0xff] }
  0xb0   : > { %v551_v41 = vld [vmem:[#allocation2 + $0x738] sm:$0xff] }
  0xb2   : > { %2275 = vxpose.xlu0.b32.cont [7/16] (narrow) %v2274_v60, 8  ;;  %v1970_v60 = vpack.c.bf16 %v470_v54, %v466_v53  ;;  %v513_v53 = vld [vmem:[#allocation2 + $0x608] sm:$0xff] }
  0xb3   : > { %v517_v54 = vld [vmem:[#allocation2 + $0x628] sm:$0xff] }
  0xb4   : > { %v1796_v61 = vpack.c.bf16 %v517_v54, %v513_v53  ;;  %v559_v53 = vld [vmem:[#allocation2 + $0x778] sm:$0xff] }
  0xb6   : > { %2277 = vxpose.xlu0.b32.cont [8/16] (narrow) %v2276_v63, 8  ;;  %v1776_v63 = vpack.c.bf16 %v477_v56, %v473_v55  ;;  %v515_v55 = vld [vmem:[#allocation2 + $0x618] sm:$0xff] }
  0xb7   : > { %v519_v56 = vld [vmem:[#allocation2 + $0x638] sm:$0xff] }
  0xb8   : > { %v1992_v62 = vpack.c.bf16 %v519_v56, %v515_v55  ;;  %v552_v56 = vld [vmem:[#allocation2 + $0x740] sm:$0xff] }
  0xba   : > { %2279 = vxpose.xlu0.b32.cont [9/16] (narrow) %v2278_v2, 8  ;;  %v478_v2 = vld [vmem:[#allocation2 + $0x4f0] sm:$0xff] }
  0xbb   : > { %v1974_v10 = vpack.c.bf16 %v478_v2, %v474_v1  ;;  %v521_v1 = vld [vmem:[#allocation2 + $0x648] sm:$0xff] }
  0xbc   : > { %v525_v2 = vld [vmem:[#allocation2 + $0x668] sm:$0xff] }
  0xbe   : > { %2281 = vxpose.xlu0.b32.cont [10/16] (narrow) %v2280_v5, 8  ;;  %v483_v5 = vld [vmem:[#allocation2 + $0x518] sm:$0xff] }
  0xc2   : > { %2283 = vxpose.xlu0.b32.cont [11/16] (narrow) %v2282_v8, 8 }
  0xc6   : > { %2285 = vxpose.xlu0.b32.cont [12/16] (narrow) %v2284_v11, 8  ;;  %v480_v11 = vld [vmem:[#allocation2 + $0x500] sm:$0xff] }
  0xc7   : > { %v1782_v21 = vpack.c.bf16 %v484_v12, %v480_v11  ;;  %v1996_v11 = vpack.c.bf16 %v527_v4, %v523_v3  ;;  %v522_v12 = vld [vmem:[#allocation2 + $0x650] sm:$0xff]  ;;  %v560_v4 = vld [vmem:[#allocation2 + $0x780] sm:$0xff] }
  0xca   : > { %2287 = vxpose.xlu0.b32.cont [13/16] (narrow) %v2286_v14, 8  ;;  %v1976_v14 = vpack.c.bf16 %v487_v6, %v483_v5 }
  0xce   : > { %2289 = vxpose.xlu0.b32.cont [14/16] (narrow) %v2288_v17, 8  ;;  %v489_v17 = vld [vmem:[#allocation2 + $0x548] sm:$0xff] }
  0xcf   : > { %v1784_v25 = vpack.c.bf16 %v493_v18, %v489_v17  ;;  %v535_v17 = vld [vmem:[#allocation2 + $0x6b8] sm:$0xff] }
  0xd2   : > { %2291 = vxpose.xlu0.b32.cont [15/16] (narrow) %v2290_v20, 8  ;;  %v495_v20 = vld [vmem:[#allocation2 + $0x578] sm:$0xff] }
  0xd3   : > { %v1980_v26 = vpack.c.bf16 %v495_v20, %v491_v19  ;;  %v528_v20 = vld [vmem:[#allocation2 + $0x680] sm:$0xff] }
  0xd6   : > { %2293 = vxpose.xlu0.b32.end [16/16] (narrow) %v2292_v23, 8  ;;  %v488_v23 = vld [vmem:[#allocation2 + $0x540] sm:$0xff] }
  0xda   : > { %v2220_v32 = vpop.trf.xlu0 }
  0xdb   : > { %v2221_v35 = vunpack.i.l.bf16 %v2220_v32  ;;  %v2224_v36 = vunpack.i.h.bf16 %v2220_v32  ;;  %v503_v32 = vld [vmem:[#allocation2 + $0x5b8] sm:$0xff] }
  0xdc   : > { %v1984_v38 = vpack.c.bf16 %v503_v32, %v499_v31  ;;  %v536_v32 = vld [vmem:[#allocation2 + $0x6c0] sm:$0xff] }
  0xdd   : > { %1026 = vmatprep.mubr.f32.mxu0 %v2221_v35  ;;  %1310 = vmatprep.mubr.f32.mxu1 %v2221_v35  ;;  %v496_v35 = vld [vmem:[#allocation2 + $0x580] sm:$0xff] }
  0xde   : > { %1027 = vmatmul.mubr.f32.vlgmr.msra.gmra.mrb[0].mxu0 %v2224_v36  ;;  %1311 = vmatmul.mubr.f32.vlgmr.msra.gmra.mrb[0].mxu1 %v2224_v36  ;;  %v2740_v7 = vpop.trf.xlu1  ;;  %v500_v36 = vld [vmem:[#allocation2 + $0x5a0] sm:$0xff] }
  0xdf   : > { %1767 = vmatpush1.bf16.msra.mxu0 %v1766_v33  ;;  %1963 = vmatpush1.bf16.msra.mxu1 %v1962_v34  ;;  %v2258_v8 = vunpack.i.l.bf16 %v2740_v7  ;;  %v1786_v33 = vpack.c.bf16 %v492_v24, %v488_v23  ;;  %v1982_v34 = vpack.c.bf16 %v494_v28, %v490_v27  ;;  %v1790_v45 = vpack.c.bf16 %v500_v36, %v496_v35  ;;  %v530_v24 = vld [vmem:[#allocation2 + $0x690] sm:$0xff]  ;;  %v541_v27 = vld [vmem:[#allocation2 + $0x6e8] sm:$0xff]  ;;  %v539_v28 = vld [vmem:[#allocation2 + $0x6d8] sm:$0xff] }
  0xe0   : > { %1769 = vmatprep.subr.bf16.mxu0 %v1768_v39  ;;  %1965 = vmatprep.subr.bf16.mxu1 %v1964_v40  ;;  %v498_v39 = vld [vmem:[#allocation2 + $0x590] sm:$0xff]  ;;  %v2000_v23 = vpack.c.bf16 %v535_v17, %v531_v16  ;;  %v2004_v35 = vpack.c.bf16 %v543_v29, %v539_v28  ;;  %v568_v17 = vld [vmem:[#allocation2 + $0x7c0] sm:$0xff] }
  0xe1   : > { %1097 = vmatprep.mubr.f32.mxu0 %v2258_v8  ;;  %1381 = vmatprep.mubr.f32.mxu1 %v2258_v8  ;;  %v502_v40 = vld [vmem:[#allocation2 + $0x5b0] sm:$0xff]  ;;  %v520_v8 = vld [vmem:[#allocation2 + $0x640] sm:$0xff] }
  0xe2   : > { %v1986_v46 = vpack.c.bf16 %v502_v40, %v498_v39  ;;  %v538_v36 = vld [vmem:[#allocation2 + $0x6d0] sm:$0xff]  ;;  %v549_v39 = vld [vmem:[#allocation2 + $0x728] sm:$0xff]  ;;  %v547_v40 = vld [vmem:[#allocation2 + $0x718] sm:$0xff] }
  0xe3   : > { %1771 = vmatpush1.bf16.msra.mxu0 %v1770_v47  ;;  %1967 = vmatpush1.bf16.msra.mxu1 %v1966_v48  ;;  %v504_v47 = vld [vmem:[#allocation2 + $0x5c0] sm:$0xff] }
  0xe4   : > { %1773 = vmatprep.subr.bf16.mxu0 %v1772_v51  ;;  %1969 = vmatprep.subr.bf16.mxu1 %v1968_v52  ;;  %v508_v48 = vld [vmem:[#allocation2 + $0x5e0] sm:$0xff]  ;;  %v506_v51 = vld [vmem:[#allocation2 + $0x5d0] sm:$0xff] }
  0xe5   : > { %v510_v52 = vld [vmem:[#allocation2 + $0x5f0] sm:$0xff]  ;;  %v1794_v57 = vpack.c.bf16 %v508_v48, %v504_v47  ;;  %v2008_v47 = vpack.c.bf16 %v551_v41, %v547_v40  ;;  %v576_v29 = vld [vmem:[#allocation2 + $0x800] sm:$0xff] }
  0xe6   : > { %v1990_v58 = vpack.c.bf16 %v510_v52, %v506_v51  ;;  %v546_v48 = vld [vmem:[#allocation2 + $0x710] sm:$0xff]  ;;  %v557_v51 = vld [vmem:[#allocation2 + $0x768] sm:$0xff]  ;;  %v555_v52 = vld [vmem:[#allocation2 + $0x758] sm:$0xff] }
  0xe7   : > { %1775 = vmatpush1.bf16.msra.mxu0 %v1774_v59  ;;  %1971 = vmatpush1.bf16.msra.mxu1 %v1970_v60  ;;  %v512_v59 = vld [vmem:[#allocation2 + $0x600] sm:$0xff] }
  0xe8   : > { %1777 = vmatprep.subr.bf16.mxu0 %v1776_v63  ;;  %1973 = vmatprep.subr.bf16.mxu1 %v1972_v0  ;;  %v516_v60 = vld [vmem:[#allocation2 + $0x620] sm:$0xff]  ;;  %v514_v63 = vld [vmem:[#allocation2 + $0x610] sm:$0xff] }
  0xe9   : > { %v518_v0 = vld [vmem:[#allocation2 + $0x630] sm:$0xff]  ;;  %v1798_v5 = vpack.c.bf16 %v516_v60, %v512_v59  ;;  %v2012_v59 = vpack.c.bf16 %v559_v53, %v555_v52  ;;  %v599_v52 = vld [vmem:[#allocation2 + $0x8b8] sm:$0xff] }
  0xea   : > { %v1994_v6 = vpack.c.bf16 %v518_v0, %v514_v63  ;;  %v554_v60 = vld [vmem:[#allocation2 + $0x750] sm:$0xff]  ;;  %v565_v63 = vld [vmem:[#allocation2 + $0x7a8] sm:$0xff]  ;;  %v563_v0 = vld [vmem:[#allocation2 + $0x798] sm:$0xff] }
  0xeb   : > { %1779 = vmatpush1.bf16.msra.mxu0 %v1778_v9  ;;  %1975 = vmatpush1.bf16.msra.mxu1 %v1974_v10  ;;  %v524_v9 = vld [vmem:[#allocation2 + $0x660] sm:$0xff]  ;;  %v1800_v10 = vpack.c.bf16 %v525_v2, %v521_v1  ;;  %v567_v1 = vld [vmem:[#allocation2 + $0x7b8] sm:$0xff] }
  0xec   : > { %1781 = vmatprep.subr.bf16.mxu0 %v1780_v13  ;;  %1977 = vmatprep.subr.bf16.mxu1 %v1976_v14  ;;  %v526_v13 = vld [vmem:[#allocation2 + $0x670] sm:$0xff]  ;;  %v529_v14 = vld [vmem:[#allocation2 + $0x688] sm:$0xff]  ;;  %v1802_v18 = vpack.c.bf16 %v524_v9, %v520_v8  ;;  %v2016_v8 = vpack.c.bf16 %v567_v1, %v563_v0  ;;  %v607_v0 = vld [vmem:[#allocation2 + $0x8f8] sm:$0xff] }
  0xed   : > { %v1998_v19 = vpack.c.bf16 %v526_v13, %v522_v12  ;;  %v562_v9 = vld [vmem:[#allocation2 + $0x790] sm:$0xff]  ;;  %v573_v12 = vld [vmem:[#allocation2 + $0x7e8] sm:$0xff]  ;;  %v571_v13 = vld [vmem:[#allocation2 + $0x7d8] sm:$0xff] }
  0xef   : > { %1783 = vmatpush1.bf16.msra.mxu0 %v1782_v21  ;;  %1979 = vmatpush1.bf16.msra.mxu1 %v1978_v22  ;;  %v532_v21 = vld [vmem:[#allocation2 + $0x6a0] sm:$0xff]  ;;  %v1804_v22 = vpack.c.bf16 %v533_v15, %v529_v14  ;;  %v575_v14 = vld [vmem:[#allocation2 + $0x7f8] sm:$0xff] }
  0xf0   : > { %1785 = vmatprep.subr.bf16.mxu0 %v1784_v25  ;;  %1981 = vmatprep.subr.bf16.mxu1 %v1980_v26  ;;  %v534_v25 = vld [vmem:[#allocation2 + $0x6b0] sm:$0xff]  ;;  %v537_v26 = vld [vmem:[#allocation2 + $0x6c8] sm:$0xff]  ;;  %v1806_v30 = vpack.c.bf16 %v532_v21, %v528_v20  ;;  %v2020_v20 = vpack.c.bf16 %v575_v14, %v571_v13  ;;  %v615_v13 = vld [vmem:[#allocation2 + $0x938] sm:$0xff] }
  0xf1   : > { %v2002_v31 = vpack.c.bf16 %v534_v25, %v530_v24  ;;  %v570_v21 = vld [vmem:[#allocation2 + $0x7d0] sm:$0xff]  ;;  %v581_v24 = vld [vmem:[#allocation2 + $0x828] sm:$0xff]  ;;  %v579_v25 = vld [vmem:[#allocation2 + $0x818] sm:$0xff] }
  0xf3   : > { %1787 = vmatpush1.bf16.msra.mxu0 %v1786_v33  ;;  %1983 = vmatpush1.bf16.msra.mxu1 %v1982_v34  ;;  %v540_v33 = vld [vmem:[#allocation2 + $0x6e0] sm:$0xff]  ;;  %v1808_v34 = vpack.c.bf16 %v541_v27, %v537_v26  ;;  %v583_v26 = vld [vmem:[#allocation2 + $0x838] sm:$0xff] }
  0xf4   : > { %1789 = vmatprep.subr.bf16.mxu0 %v1788_v37  ;;  %1985 = vmatprep.subr.bf16.mxu1 %v1984_v38  ;;  %v542_v37 = vld [vmem:[#allocation2 + $0x6f0] sm:$0xff]  ;;  %v545_v38 = vld [vmem:[#allocation2 + $0x708] sm:$0xff]  ;;  %v1810_v42 = vpack.c.bf16 %v540_v33, %v536_v32  ;;  %v2024_v32 = vpack.c.bf16 %v583_v26, %v579_v25  ;;  %v623_v25 = vld [vmem:[#allocation2 + $0x978] sm:$0xff] }
  0xf5   : > { %v2006_v43 = vpack.c.bf16 %v542_v37, %v538_v36  ;;  %v578_v33 = vld [vmem:[#allocation2 + $0x810] sm:$0xff]  ;;  %v589_v36 = vld [vmem:[#allocation2 + $0x868] sm:$0xff]  ;;  %v587_v37 = vld [vmem:[#allocation2 + $0x858] sm:$0xff] }
  0xf7   : > { %1791 = vmatpush1.bf16.msra.mxu0 %v1790_v45  ;;  %1987 = vmatpush1.bf16.msra.mxu1 %v1986_v46  ;;  %v548_v45 = vld [vmem:[#allocation2 + $0x720] sm:$0xff]  ;;  %v1812_v46 = vpack.c.bf16 %v549_v39, %v545_v38  ;;  %v591_v38 = vld [vmem:[#allocation2 + $0x878] sm:$0xff]  ;;  %v2261_v39 = vunpack.i.h.bf16 %v2740_v7 }
  0xf8   : > { %1793 = vmatprep.subr.bf16.mxu0 %v1792_v49  ;;  %1989 = vmatprep.subr.bf16.mxu1 %v1988_v50  ;;  %v550_v49 = vld [vmem:[#allocation2 + $0x730] sm:$0xff]  ;;  %v553_v50 = vld [vmem:[#allocation2 + $0x748] sm:$0xff]  ;;  %v1814_v54 = vpack.c.bf16 %v548_v45, %v544_v44  ;;  %v588_v44 = vld [vmem:[#allocation2 + $0x860] sm:$0xff] }
  0xf9   : > { %v2010_v55 = vpack.c.bf16 %v550_v49, %v546_v48  ;;  %v590_v48 = vld [vmem:[#allocation2 + $0x870] sm:$0xff]  ;;  %v593_v49 = vld [vmem:[#allocation2 + $0x888] sm:$0xff] }
  0xfb   : > { %1795 = vmatpush1.bf16.msra.mxu0 %v1794_v57  ;;  %1991 = vmatpush1.bf16.msra.mxu1 %v1990_v58  ;;  %v556_v57 = vld [vmem:[#allocation2 + $0x760] sm:$0xff]  ;;  %v1816_v58 = vpack.c.bf16 %v557_v51, %v553_v50  ;;  %v597_v50 = vld [vmem:[#allocation2 + $0x8a8] sm:$0xff]  ;;  %v595_v51 = vld [vmem:[#allocation2 + $0x898] sm:$0xff] }
  0xfc   : > { %1797 = vmatprep.subr.bf16.mxu0 %v1796_v61  ;;  %1993 = vmatprep.subr.bf16.mxu1 %v1992_v62  ;;  %v558_v61 = vld [vmem:[#allocation2 + $0x770] sm:$0xff]  ;;  %v561_v62 = vld [vmem:[#allocation2 + $0x788] sm:$0xff]  ;;  %v1818_v2 = vpack.c.bf16 %v556_v57, %v552_v56  ;;  %v596_v56 = vld [vmem:[#allocation2 + $0x8a0] sm:$0xff]  ;;  %v1836_v57 = vpack.c.bf16 %v597_v50, %v593_v49 }
  0xfd   : > { %v2014_v3 = vpack.c.bf16 %v558_v61, %v554_v60  ;;  %v598_v60 = vld [vmem:[#allocation2 + $0x8b0] sm:$0xff]  ;;  %v601_v61 = vld [vmem:[#allocation2 + $0x8c8] sm:$0xff]  ;;  %v635_v49 = vld [vmem:[#allocation2 + $0x9d8] sm:$0xff] }
  0xfe   : > { %v639_v50 = vld [vmem:[#allocation2 + $0x9f8] sm:$0xff] }
  0xff   : > { %1799 = vmatpush1.bf16.msra.mxu0 %v1798_v5  ;;  %1995 = vmatpush1.bf16.msra.mxu1 %v1994_v6  ;;  %v564_v5 = vld [vmem:[#allocation2 + $0x7a0] sm:$0xff]  ;;  %v1820_v6 = vpack.c.bf16 %v565_v63, %v561_v62  ;;  %v605_v62 = vld [vmem:[#allocation2 + $0x8e8] sm:$0xff]  ;;  %v603_v63 = vld [vmem:[#allocation2 + $0x8d8] sm:$0xff] }
 0x100   : > { %1801 = vmatprep.subr.bf16.mxu0 %v1800_v10  ;;  %1997 = vmatprep.subr.bf16.mxu1 %v1996_v11  ;;  %v566_v10 = vld [vmem:[#allocation2 + $0x7b0] sm:$0xff]  ;;  %v569_v11 = vld [vmem:[#allocation2 + $0x7c8] sm:$0xff]  ;;  %v1822_v15 = vpack.c.bf16 %v564_v5, %v560_v4  ;;  %v604_v4 = vld [vmem:[#allocation2 + $0x8e0] sm:$0xff]  ;;  %v1840_v5 = vpack.c.bf16 %v605_v62, %v601_v61 }
 0x101   : > { %v2018_v16 = vpack.c.bf16 %v566_v10, %v562_v9  ;;  %v606_v9 = vld [vmem:[#allocation2 + $0x8f0] sm:$0xff]  ;;  %v609_v10 = vld [vmem:[#allocation2 + $0x908] sm:$0xff]  ;;  %v647_v61 = vld [vmem:[#allocation2 + $0xa38] sm:$0xff] }
 0x103   : > { %1803 = vmatpush1.bf16.msra.mxu0 %v1802_v18  ;;  %1999 = vmatpush1.bf16.msra.mxu1 %v1998_v19  ;;  %v572_v18 = vld [vmem:[#allocation2 + $0x7e0] sm:$0xff]  ;;  %v1824_v19 = vpack.c.bf16 %v573_v12, %v569_v11  ;;  %v613_v11 = vld [vmem:[#allocation2 + $0x928] sm:$0xff]  ;;  %v611_v12 = vld [vmem:[#allocation2 + $0x918] sm:$0xff] }
 0x104   : > { %1805 = vmatprep.subr.bf16.mxu0 %v1804_v22  ;;  %2001 = vmatprep.subr.bf16.mxu1 %v2000_v23  ;;  %v574_v22 = vld [vmem:[#allocation2 + $0x7f0] sm:$0xff]  ;;  %v577_v23 = vld [vmem:[#allocation2 + $0x808] sm:$0xff]  ;;  %v1826_v27 = vpack.c.bf16 %v572_v18, %v568_v17  ;;  %v612_v17 = vld [vmem:[#allocation2 + $0x920] sm:$0xff]  ;;  %v1844_v18 = vpack.c.bf16 %v613_v11, %v609_v10 }
 0x105   : > { %v2022_v28 = vpack.c.bf16 %v574_v22, %v570_v21  ;;  %v614_v21 = vld [vmem:[#allocation2 + $0x930] sm:$0xff]  ;;  %v617_v22 = vld [vmem:[#allocation2 + $0x948] sm:$0xff]  ;;  %v655_v10 = vld [vmem:[#allocation2 + $0xa78] sm:$0xff] }
 0x107   : > { %1807 = vmatpush1.bf16.msra.mxu0 %v1806_v30  ;;  %2003 = vmatpush1.bf16.msra.mxu1 %v2002_v31  ;;  %v580_v30 = vld [vmem:[#allocation2 + $0x820] sm:$0xff]  ;;  %v1828_v31 = vpack.c.bf16 %v581_v24, %v577_v23  ;;  %v621_v23 = vld [vmem:[#allocation2 + $0x968] sm:$0xff]  ;;  %v619_v24 = vld [vmem:[#allocation2 + $0x958] sm:$0xff] }
 0x108   : > { %1809 = vmatprep.subr.bf16.mxu0 %v1808_v34  ;;  %2005 = vmatprep.subr.bf16.mxu1 %v2004_v35  ;;  %v582_v34 = vld [vmem:[#allocation2 + $0x830] sm:$0xff]  ;;  %v585_v35 = vld [vmem:[#allocation2 + $0x848] sm:$0xff]  ;;  %v1830_v41 = vpack.c.bf16 %v580_v30, %v576_v29  ;;  %v620_v29 = vld [vmem:[#allocation2 + $0x960] sm:$0xff]  ;;  %v1848_v30 = vpack.c.bf16 %v621_v23, %v617_v22 }
 0x109   : > { %v1832_v45 = vpack.c.bf16 %v589_v36, %v585_v35  ;;  %v629_v35 = vld [vmem:[#allocation2 + $0x9a8] sm:$0xff]  ;;  %v627_v36 = vld [vmem:[#allocation2 + $0x998] sm:$0xff] }
 0x10a   : > { %v663_v22 = vld [vmem:[#allocation2 + $0xab8] sm:$0xff] }
 0x10b   : > { %1811 = vmatpush1.bf16.msra.mxu0 %v1810_v42  ;;  %2007 = vmatpush1.bf16.msra.mxu1 %v2006_v43  ;;  %v2026_v42 = vpack.c.bf16 %v582_v34, %v578_v33  ;;  %v584_v43 = vld [vmem:[#allocation2 + $0x840] sm:$0xff]  ;;  %v622_v33 = vld [vmem:[#allocation2 + $0x970] sm:$0xff]  ;;  %v625_v34 = vld [vmem:[#allocation2 + $0x988] sm:$0xff] }
 0x10c   : > { %1813 = vmatprep.subr.bf16.mxu0 %v1812_v46  ;;  %2009 = vmatprep.subr.bf16.mxu1 %v2008_v47  ;;  %v2028_v46 = vpack.c.bf16 %v591_v38, %v587_v37  ;;  %v586_v47 = vld [vmem:[#allocation2 + $0x850] sm:$0xff]  ;;  %v1834_v53 = vpack.c.bf16 %v588_v44, %v584_v43  ;;  %v631_v37 = vld [vmem:[#allocation2 + $0x9b8] sm:$0xff]  ;;  %v1852_v43 = vpack.c.bf16 %v629_v35, %v625_v34 }
 0x10d   : > { %v2048_v44 = vpack.c.bf16 %v631_v37, %v627_v36  ;;  %v671_v34 = vld [vmem:[#allocation2 + $0xaf8] sm:$0xff]  ;;  %v664_v37 = vld [vmem:[#allocation2 + $0xac0] sm:$0xff] }
 0x10f   : > { %1815 = vmatpush1.bf16.msra.mxu0 %v1814_v54  ;;  %2011 = vmatpush1.bf16.msra.mxu1 %v2010_v55  ;;  %v2030_v54 = vpack.c.bf16 %v590_v48, %v586_v47  ;;  %v592_v55 = vld [vmem:[#allocation2 + $0x880] sm:$0xff]  ;;  %v633_v47 = vld [vmem:[#allocation2 + $0x9c8] sm:$0xff] }
 0x110   : > { %1817 = vmatprep.subr.bf16.mxu0 %v1816_v58  ;;  %2013 = vmatprep.subr.bf16.mxu1 %v2012_v59  ;;  %v2032_v58 = vpack.c.bf16 %v599_v52, %v595_v51  ;;  %v594_v59 = vld [vmem:[#allocation2 + $0x890] sm:$0xff]  ;;  %v1838_v1 = vpack.c.bf16 %v596_v56, %v592_v55  ;;  %v637_v48 = vld [vmem:[#allocation2 + $0x9e8] sm:$0xff]  ;;  %v2052_v55 = vpack.c.bf16 %v639_v50, %v635_v49  ;;  %v672_v50 = vld [vmem:[#allocation2 + $0xb00] sm:$0xff] }
 0x111   : > { %v634_v56 = vld [vmem:[#allocation2 + $0x9d0] sm:$0xff] }
 0x113   : > { %1819 = vmatpush1.bf16.msra.mxu0 %v1818_v2  ;;  %2015 = vmatpush1.bf16.msra.mxu1 %v2014_v3  ;;  %v2034_v2 = vpack.c.bf16 %v598_v60, %v594_v59  ;;  %v600_v3 = vld [vmem:[#allocation2 + $0x8c0] sm:$0xff]  ;;  %v645_v59 = vld [vmem:[#allocation2 + $0xa28] sm:$0xff]  ;;  %v643_v60 = vld [vmem:[#allocation2 + $0xa18] sm:$0xff] }
 0x114   : > { %1821 = vmatprep.subr.bf16.mxu0 %v1820_v6  ;;  %2017 = vmatprep.subr.bf16.mxu1 %v2016_v8  ;;  %v2036_v6 = vpack.c.bf16 %v607_v0, %v603_v63  ;;  %v602_v8 = vld [vmem:[#allocation2 + $0x8d0] sm:$0xff]  ;;  %v1842_v14 = vpack.c.bf16 %v604_v4, %v600_v3  ;;  %v640_v0 = vld [vmem:[#allocation2 + $0xa00] sm:$0xff]  ;;  %v2056_v3 = vpack.c.bf16 %v647_v61, %v643_v60 }
 0x115   : > { %v642_v4 = vld [vmem:[#allocation2 + $0xa10] sm:$0xff]  ;;  %v680_v61 = vld [vmem:[#allocation2 + $0xb40] sm:$0xff] }
 0x117   : > { %1823 = vmatpush1.bf16.msra.mxu0 %v1822_v15  ;;  %2019 = vmatpush1.bf16.msra.mxu1 %v2018_v16  ;;  %v2038_v15 = vpack.c.bf16 %v606_v9, %v602_v8  ;;  %v608_v16 = vld [vmem:[#allocation2 + $0x900] sm:$0xff]  ;;  %v653_v8 = vld [vmem:[#allocation2 + $0xa68] sm:$0xff]  ;;  %v651_v9 = vld [vmem:[#allocation2 + $0xa58] sm:$0xff] }
 0x118   : > { %1825 = vmatprep.subr.bf16.mxu0 %v1824_v19  ;;  %2021 = vmatprep.subr.bf16.mxu1 %v2020_v20  ;;  %v2040_v19 = vpack.c.bf16 %v615_v13, %v611_v12  ;;  %v610_v20 = vld [vmem:[#allocation2 + $0x910] sm:$0xff]  ;;  %v1846_v26 = vpack.c.bf16 %v612_v17, %v608_v16  ;;  %v648_v13 = vld [vmem:[#allocation2 + $0xa40] sm:$0xff]  ;;  %v2060_v16 = vpack.c.bf16 %v655_v10, %v651_v9 }
 0x119   : > { %v650_v17 = vld [vmem:[#allocation2 + $0xa50] sm:$0xff]  ;;  %v688_v10 = vld [vmem:[#allocation2 + $0xb80] sm:$0xff] }
 0x11a   : > { %v2744_v40 = vpop.trf.xlu0 }
 0x11b   : > { %1827 = vmatpush1.bf16.msra.mxu0 %v1826_v27  ;;  %2023 = vmatpush1.bf16.msra.mxu1 %v2022_v28  ;;  %v2295_v7 = vunpack.i.l.bf16 %v2744_v40  ;;  %v2042_v27 = vpack.c.bf16 %v614_v21, %v610_v20  ;;  %v616_v28 = vld [vmem:[#allocation2 + $0x940] sm:$0xff]  ;;  %v661_v20 = vld [vmem:[#allocation2 + $0xaa8] sm:$0xff]  ;;  %v659_v21 = vld [vmem:[#allocation2 + $0xa98] sm:$0xff] }
 0x11c   : > { %1829 = vmatprep.subr.bf16.mxu0 %v1828_v31  ;;  %2025 = vmatprep.subr.bf16.mxu1 %v2024_v32  ;;  %v2044_v31 = vpack.c.bf16 %v623_v25, %v619_v24  ;;  %v618_v32 = vld [vmem:[#allocation2 + $0x950] sm:$0xff]  ;;  %v1850_v38 = vpack.c.bf16 %v620_v29, %v616_v28  ;;  %v656_v25 = vld [vmem:[#allocation2 + $0xa80] sm:$0xff]  ;;  %v2064_v28 = vpack.c.bf16 %v663_v22, %v659_v21 }
 0x11d   : > { %v658_v29 = vld [vmem:[#allocation2 + $0xa90] sm:$0xff]  ;;  %v696_v22 = vld [vmem:[#allocation2 + $0xbc0] sm:$0xff] }
 0x11e   : > { %1098 = vmatmul.mubr.f32.vlgmr.msra.gmra.mrb[0].mxu0 %v2261_v39  ;;  %1382 = vmatmul.mubr.f32.vlgmr.msra.gmra.mrb[0].mxu1 %v2261_v39  ;;  %v2046_v39 = vpack.c.bf16 %v622_v33, %v618_v32  ;;  %v669_v32 = vld [vmem:[#allocation2 + $0xae8] sm:$0xff]  ;;  %v667_v33 = vld [vmem:[#allocation2 + $0xad8] sm:$0xff] }
 0x11f   : > { %1831 = vmatpush1.bf16.msra.mxu0 %v1830_v41  ;;  %2027 = vmatpush1.bf16.msra.mxu1 %v2026_v42  ;;  %v624_v41 = vld [vmem:[#allocation2 + $0x980] sm:$0xff] }
 0x120   : > { %1833 = vmatprep.subr.bf16.mxu0 %v1832_v45  ;;  %2029 = vmatprep.subr.bf16.mxu1 %v2028_v46  ;;  %v628_v42 = vld [vmem:[#allocation2 + $0x9a0] sm:$0xff]  ;;  %v626_v45 = vld [vmem:[#allocation2 + $0x990] sm:$0xff] }
 0x121   : > { %1168 = vmatprep.mubr.f32.mxu0 %v2295_v7  ;;  %1452 = vmatprep.mubr.f32.mxu1 %v2295_v7  ;;  %v630_v46 = vld [vmem:[#allocation2 + $0x9b0] sm:$0xff]  ;;  %v1854_v51 = vpack.c.bf16 %v628_v42, %v624_v41  ;;  %v632_v7 = vld [vmem:[#allocation2 + $0x9c0] sm:$0xff]  ;;  %v2068_v41 = vpack.c.bf16 %v671_v34, %v667_v33 }
 0x122   : > { %v2050_v52 = vpack.c.bf16 %v630_v46, %v626_v45  ;;  %v666_v42 = vld [vmem:[#allocation2 + $0xad0] sm:$0xff]  ;;  %v677_v45 = vld [vmem:[#allocation2 + $0xb28] sm:$0xff]  ;;  %v675_v46 = vld [vmem:[#allocation2 + $0xb18] sm:$0xff] }
 0x123   : > { %1835 = vmatpush1.bf16.msra.mxu0 %v1834_v53  ;;  %2031 = vmatpush1.bf16.msra.mxu1 %v2030_v54  ;;  %v636_v53 = vld [vmem:[#allocation2 + $0x9e0] sm:$0xff]  ;;  %v1856_v54 = vpack.c.bf16 %v637_v48, %v633_v47  ;;  %v679_v47 = vld [vmem:[#allocation2 + $0xb38] sm:$0xff] }
 0x124   : > { %1837 = vmatprep.subr.bf16.mxu0 %v1836_v57  ;;  %2033 = vmatprep.subr.bf16.mxu1 %v2032_v58  ;;  %v638_v57 = vld [vmem:[#allocation2 + $0x9f0] sm:$0xff]  ;;  %v641_v58 = vld [vmem:[#allocation2 + $0xa08] sm:$0xff]  ;;  %v1858_v62 = vpack.c.bf16 %v636_v53, %v632_v7  ;;  %v2072_v7 = vpack.c.bf16 %v679_v47, %v675_v46  ;;  %v704_v34 = vld [vmem:[#allocation2 + $0xc00] sm:$0xff]  ;;  %v714_v46 = vlaneseq }
 0x125   : > { %v2054_v63 = vpack.c.bf16 %v638_v57, %v634_v56  ;;  %v674_v53 = vld [vmem:[#allocation2 + $0xb10] sm:$0xff]  ;;  %v685_v56 = vld [vmem:[#allocation2 + $0xb68] sm:$0xff]  ;;  %v683_v57 = vld [vmem:[#allocation2 + $0xb58] sm:$0xff] }
 0x126   : > { %v715_v47 = vshrl.u32 %v714_v46, 7 }
 0x127   : > { %1839 = vmatpush1.bf16.msra.mxu0 %v1838_v1  ;;  %2035 = vmatpush1.bf16.msra.mxu1 %v2034_v2  ;;  %v644_v1 = vld [vmem:[#allocation2 + $0xa20] sm:$0xff]  ;;  %v1860_v2 = vpack.c.bf16 %v645_v59, %v641_v58  ;;  %v687_v58 = vld [vmem:[#allocation2 + $0xb78] sm:$0xff] }
 0x128   : > { %1841 = vmatprep.subr.bf16.mxu0 %v1840_v5  ;;  %2037 = vmatprep.subr.bf16.mxu1 %v2036_v6  ;;  %v646_v5 = vld [vmem:[#allocation2 + $0xa30] sm:$0xff]  ;;  %v649_v6 = vld [vmem:[#allocation2 + $0xa48] sm:$0xff]  ;;  %v1862_v11 = vpack.c.bf16 %v644_v1, %v640_v0  ;;  %v2076_v0 = vpack.c.bf16 %v687_v58, %v683_v57 }
 0x129   : > { %v2058_v12 = vpack.c.bf16 %v646_v5, %v642_v4  ;;  %v682_v1 = vld [vmem:[#allocation2 + $0xb50] sm:$0xff]  ;;  %v693_v4 = vld [vmem:[#allocation2 + $0xba8] sm:$0xff]  ;;  %v691_v5 = vld [vmem:[#allocation2 + $0xb98] sm:$0xff] }
 0x12b   : > { %1843 = vmatpush1.bf16.msra.mxu0 %v1842_v14  ;;  %2039 = vmatpush1.bf16.msra.mxu1 %v2038_v15  ;;  %v652_v14 = vld [vmem:[#allocation2 + $0xa60] sm:$0xff]  ;;  %v1864_v15 = vpack.c.bf16 %v653_v8, %v649_v6  ;;  %v695_v6 = vld [vmem:[#allocation2 + $0xbb8] sm:$0xff] }
 0x12c   : > { %1845 = vmatprep.subr.bf16.mxu0 %v1844_v18  ;;  %2041 = vmatprep.subr.bf16.mxu1 %v2040_v19  ;;  %v654_v18 = vld [vmem:[#allocation2 + $0xa70] sm:$0xff]  ;;  %v657_v19 = vld [vmem:[#allocation2 + $0xa88] sm:$0xff]  ;;  %v1866_v23 = vpack.c.bf16 %v652_v14, %v648_v13  ;;  %v2080_v13 = vpack.c.bf16 %v695_v6, %v691_v5 }
 0x12d   : > { %v2062_v24 = vpack.c.bf16 %v654_v18, %v650_v17  ;;  %v690_v14 = vld [vmem:[#allocation2 + $0xb90] sm:$0xff]  ;;  %v701_v17 = vld [vmem:[#allocation2 + $0xbe8] sm:$0xff]  ;;  %v699_v18 = vld [vmem:[#allocation2 + $0xbd8] sm:$0xff] }
 0x12f   : > { %1847 = vmatpush1.bf16.msra.mxu0 %v1846_v26  ;;  %2043 = vmatpush1.bf16.msra.mxu1 %v2042_v27  ;;  %v660_v26 = vld [vmem:[#allocation2 + $0xaa0] sm:$0xff]  ;;  %v1868_v27 = vpack.c.bf16 %v661_v20, %v657_v19  ;;  %v703_v19 = vld [vmem:[#allocation2 + $0xbf8] sm:$0xff] }
 0x130   : > { %1849 = vmatprep.subr.bf16.mxu0 %v1848_v30  ;;  %2045 = vmatprep.subr.bf16.mxu1 %v2044_v31  ;;  %v662_v30 = vld [vmem:[#allocation2 + $0xab0] sm:$0xff]  ;;  %v665_v31 = vld [vmem:[#allocation2 + $0xac8] sm:$0xff]  ;;  %v1870_v35 = vpack.c.bf16 %v660_v26, %v656_v25  ;;  %v2084_v25 = vpack.c.bf16 %v703_v19, %v699_v18 }
 0x131   : > { %v2066_v36 = vpack.c.bf16 %v662_v30, %v658_v29  ;;  %v698_v26 = vld [vmem:[#allocation2 + $0xbd0] sm:$0xff]  ;;  %v709_v29 = vld [vmem:[#allocation2 + $0xc28] sm:$0xff]  ;;  %v707_v30 = vld [vmem:[#allocation2 + $0xc18] sm:$0xff] }
 0x133   : > { %1851 = vmatpush1.bf16.msra.mxu0 %v1850_v38  ;;  %2047 = vmatpush1.bf16.msra.mxu1 %v2046_v39  ;;  %v668_v38 = vld [vmem:[#allocation2 + $0xae0] sm:$0xff]  ;;  %v1872_v39 = vpack.c.bf16 %v669_v32, %v665_v31  ;;  %v711_v31 = vld [vmem:[#allocation2 + $0xc38] sm:$0xff] }
 0x134   : > { %1853 = vmatprep.subr.bf16.mxu0 %v1852_v43  ;;  %2049 = vmatprep.subr.bf16.mxu1 %v2048_v44  ;;  %v670_v43 = vld [vmem:[#allocation2 + $0xaf0] sm:$0xff]  ;;  %v673_v44 = vld [vmem:[#allocation2 + $0xb08] sm:$0xff]  ;;  %v1874_v48 = vpack.c.bf16 %v668_v38, %v664_v37  ;;  %v708_v37 = vld [vmem:[#allocation2 + $0xc20] sm:$0xff] }
 0x135   : > { %v2070_v49 = vpack.c.bf16 %v670_v43, %v666_v42  ;;  %v706_v38 = vld [vmem:[#allocation2 + $0xc10] sm:$0xff]  ;;  %v1894_v42 = vpack.c.bf16 %v708_v37, %v704_v34 }
 0x137   : > { %1855 = vmatpush1.bf16.msra.mxu0 %v1854_v51  ;;  %2051 = vmatpush1.bf16.msra.mxu1 %v2050_v52  ;;  %v676_v51 = vld [vmem:[#allocation2 + $0xb20] sm:$0xff]  ;;  %v1876_v52 = vpack.c.bf16 %v677_v45, %v673_v44  ;;  %v2471_v44 = vmov 0.0   ;;  %v942_v45 = vpop.trf.xlu1 }
 0x138   : > { %1857 = vmatprep.subr.bf16.mxu0 %v1856_v54  ;;  %2053 = vmatprep.subr.bf16.mxu1 %v2052_v55  ;;  %v678_v54 = vld [vmem:[#allocation2 + $0xb30] sm:$0xff]  ;;  %v681_v55 = vld [vmem:[#allocation2 + $0xb48] sm:$0xff]  ;;  %v1878_v59 = vpack.c.bf16 %v676_v51, %v672_v50  ;;  %v720_v50 = vsub.s32 1, %v715_v47  ;;  %v728_v51 = vsub.s32 3, %v715_v47 }
 0x139   : > { %v2074_v60 = vpack.c.bf16 %v678_v54, %v674_v53 }
 0x13b   : > { %1859 = vmatpush1.bf16.msra.mxu0 %v1858_v62  ;;  %2055 = vmatpush1.bf16.msra.mxu1 %v2054_v63  ;;  %v684_v62 = vld [vmem:[#allocation2 + $0xb60] sm:$0xff]  ;;  %v1880_v63 = vpack.c.bf16 %v685_v56, %v681_v55 }
 0x13c   : > { %1861 = vmatprep.subr.bf16.mxu0 %v1860_v2  ;;  %2057 = vmatprep.subr.bf16.mxu1 %v2056_v3  ;;  %v686_v2 = vld [vmem:[#allocation2 + $0xb70] sm:$0xff]  ;;  %v689_v3 = vld [vmem:[#allocation2 + $0xb88] sm:$0xff]  ;;  %v1882_v8 = vpack.c.bf16 %v684_v62, %v680_v61 }
 0x13d   : > { %v2078_v9 = vpack.c.bf16 %v686_v2, %v682_v1 }
 0x13f   : > { %1863 = vmatpush1.bf16.msra.mxu0 %v1862_v11  ;;  %2059 = vmatpush1.bf16.msra.mxu1 %v2058_v12  ;;  %v692_v11 = vld [vmem:[#allocation2 + $0xba0] sm:$0xff]  ;;  %v1884_v12 = vpack.c.bf16 %v693_v4, %v689_v3 }
 0x140   : > { %1865 = vmatprep.subr.bf16.mxu0 %v1864_v15  ;;  %2061 = vmatprep.subr.bf16.mxu1 %v2060_v16  ;;  %v694_v15 = vld [vmem:[#allocation2 + $0xbb0] sm:$0xff]  ;;  %v697_v16 = vld [vmem:[#allocation2 + $0xbc8] sm:$0xff]  ;;  %v1886_v20 = vpack.c.bf16 %v692_v11, %v688_v10 }
 0x141   : > { %v2082_v21 = vpack.c.bf16 %v694_v15, %v690_v14 }
 0x143   : > { %1867 = vmatpush1.bf16.msra.mxu0 %v1866_v23  ;;  %2063 = vmatpush1.bf16.msra.mxu1 %v2062_v24  ;;  %v700_v23 = vld [vmem:[#allocation2 + $0xbe0] sm:$0xff]  ;;  %v1888_v24 = vpack.c.bf16 %v701_v17, %v697_v16 }
 0x144   : > { %1869 = vmatprep.subr.bf16.mxu0 %v1868_v27  ;;  %2065 = vmatprep.subr.bf16.mxu1 %v2064_v28  ;;  %v702_v27 = vld [vmem:[#allocation2 + $0xbf0] sm:$0xff]  ;;  %v705_v28 = vld [vmem:[#allocation2 + $0xc08] sm:$0xff]  ;;  %v1890_v32 = vpack.c.bf16 %v700_v23, %v696_v22 }
 0x145   : > { %v2086_v33 = vpack.c.bf16 %v702_v27, %v698_v26 }
 0x147   : > { %1871 = vmatpush1.bf16.msra.mxu0 %v1870_v35  ;;  %2067 = vmatpush1.bf16.msra.mxu1 %v2066_v36  ;;  %v1892_v35 = vpack.c.bf16 %v709_v29, %v705_v28  ;;  %v2088_v36 = vpack.c.bf16 %v711_v31, %v707_v30 }
 0x148   : > { %1873 = vmatprep.subr.bf16.mxu0 %v1872_v39  ;;  %2069 = vmatprep.subr.bf16.mxu1 %v2068_v41  ;;  %v710_v39 = vld [vmem:[#allocation2 + $0xc30] sm:$0xff]  ;;  %v2298_v41 = vunpack.i.h.bf16 %v2744_v40  ;;  %v716_v40 = vsub.s32 0, %v715_v47 }
 0x149   : > { %v2090_v43 = vpack.c.bf16 %v710_v39, %v706_v38 }
 0x14b   : > { %1875 = vmatpush1.bf16.msra.mxu0 %v1874_v48  ;;  %2071 = vmatpush1.bf16.msra.mxu1 %v2070_v49  ;;  %v724_v48 = vsub.s32 2, %v715_v47  ;;  %v712_v49 = vld [vmem:[#allocation5] sm:$0xf] }
 0x14c   : > { %1877 = vmatprep.subr.bf16.mxu0 %v1876_v52  ;;  %2073 = vmatprep.subr.bf16.mxu1 %v2072_v7  ;;  %v717_v52 = vrot.slane %v712_v49, %v716_v40  ;;  %v721_v53 = vrot.slane %v712_v49, %v720_v50  ;;  %v729_v54 = vrot.slane %v712_v49, %v728_v51 }
 0x14d   : > { %v725_v7 = vrot.slane %v712_v49, %v724_v48 }
 0x14f   : > { %1879 = vmatpush1.bf16.msra.mxu0 %v1878_v59  ;;  %2075 = vmatpush1.bf16.msra.mxu1 %v2074_v60 }
 0x150   : > { %1881 = vmatprep.subr.bf16.mxu0 %v1880_v63  ;;  %2077 = vmatprep.subr.bf16.mxu1 %v2076_v0 }
 0x153   : > { %1883 = vmatpush1.bf16.msra.mxu0 %v1882_v8  ;;  %2079 = vmatpush1.bf16.msra.mxu1 %v2078_v9 }
 0x154   : > { %1885 = vmatprep.subr.bf16.mxu0 %v1884_v12  ;;  %2081 = vmatprep.subr.bf16.mxu1 %v2080_v13 }
 0x157   : > { %1887 = vmatpush1.bf16.msra.mxu0 %v1886_v20  ;;  %2083 = vmatpush1.bf16.msra.mxu1 %v2082_v21 }
 0x158   : > { %1889 = vmatprep.subr.bf16.mxu0 %v1888_v24  ;;  %2085 = vmatprep.subr.bf16.mxu1 %v2084_v25 }
 0x15b   : > { %1891 = vmatpush1.bf16.msra.mxu0 %v1890_v32  ;;  %2087 = vmatpush1.bf16.msra.mxu1 %v2086_v33 }
 0x15c   : > { %1893 = vmatprep.subr.bf16.mxu0 %v1892_v35  ;;  %2089 = vmatprep.subr.bf16.mxu1 %v2088_v36 }
 0x15e   : > { %1169 = vmatmul.mubr.f32.vlgmr.msra.gmra.mrb[0].mxu0 %v2298_v41  ;;  %1453 = vmatmul.mubr.f32.vlgmr.msra.gmra.mrb[0].mxu1 %v2298_v41 }
 0x15f   : > { %1895 = vmatpush1.bf16.msra.mxu0 %v1894_v42  ;;  %2091 = vmatpush1.bf16.msra.mxu1 %v2090_v43 }
 0x160   : > { %1239 = vmatprep.mubr.f32.mxu0 %v2471_v44  ;;  %1523 = vmatprep.mubr.f32.mxu1 %v2471_v44 }
 0x166   : > { %1688 = vmatmul.mubr.msk.f32.vlgmr.msra.gmra.mrb[0].mxu0 %vm958_vm0, %v942_v45  ;;  %1689 = vmatmul.mubr.msk.f32.vlgmr.msra.gmra.mrb[0].mxu1 %vm958_vm0, %v942_v45 }
 0x239   : > { %v1241_v55 = vpop.f32.mrb[0].mxu0  ;;  %v1525_v56 = vpop.f32.mrb[0].mxu1 }
 0x23a   : > { %v2092_v57 = vadd.f32 %v1241_v55, %v717_v52  ;;  %v2094_v58 = vadd.f32 %v1525_v56, %v725_v7  ;;  %v1243_v59 = vpop.f32.mrb[1].mxu0  ;;  %v1527_v60 = vpop.f32.mrb[1].mxu1 }
 0x23b   : > { %v2093_v61 = vadd.f32 %v1243_v59, %v721_v53  ;;  %v2095_v62 = vadd.f32 %v1527_v60, %v729_v54 }
 0x23c   : > { %2299 = vtanh.f32 %v2092_v57 }
 0x23d   : > { %2301 = vtanh.f32 %v2094_v58 }
 0x23e   : > { %2303 = vtanh.f32 %v2093_v61 }
 0x23f   : > { %2305 = vtanh.f32 %v2095_v62 }
 0x246   : > { %v2300_v63 = vpop.eup %2299 }
 0x247   : > { %v2302_v0 = vpop.eup %2301  ;;  %v1690_v1 = vmul.f32 -1.442695, %v2300_v63 }
 0x248   : > { %v2304_v2 = vpop.eup %2303  ;;  %v1692_v3 = vmul.f32 -1.442695, %v2302_v0 }
 0x249   : > { %v2306_v4 = vpop.eup %2305  ;;  %2307 = vpow2.f32 %v1690_v1  ;;  %v1691_v5 = vmul.f32 -1.442695, %v2304_v2 }
 0x24a   : > { %2309 = vpow2.f32 %v1692_v3  ;;  %v1693_v6 = vmul.f32 -1.442695, %v2306_v4 }
 0x24b   : > { %2311 = vpow2.f32 %v1691_v5 }
 0x24c   : > { %2313 = vpow2.f32 %v1693_v6 }
 0x253   : > { %v2308_v8 = vpop.eup %2307 }
 0x254   : > { %v2310_v9 = vpop.eup %2309  ;;  %v1546_v10 = vadd.f32 1.0, %v2308_v8 }
 0x255   : > { %v2312_v11 = vpop.eup %2311  ;;  %v1548_v12 = vadd.f32 1.0, %v2310_v9 }
 0x256   : > { %v2314_v13 = vpop.eup %2313  ;;  %2315 = vrcp.f32 %v1546_v10  ;;  %v1547_v14 = vadd.f32 1.0, %v2312_v11 }
 0x257   : > { %2317 = vrcp.f32 %v1548_v12  ;;  %v1549_v15 = vadd.f32 1.0, %v2314_v13 }
 0x258   : > { %2319 = vrcp.f32 %v1547_v14 }
 0x259   : > { %2321 = vrcp.f32 %v1549_v15 }
 0x260   : > { %v2316_v16 = vpop.eup %2315 }
 0x261   : > { %v2318_v17 = vpop.eup %2317  ;;  %1558 = vst [vmem:[%s213_s7] sm:$0xff] %v2316_v16 }
 0x262   : > { %v2320_v18 = vpop.eup %2319  ;;  %1560 = vst [vmem:[%s213_s7 + $0x10] sm:$0xff] %v2318_v17 }
 0x263   : > { %v2322_v19 = vpop.eup %2321  ;;  %1559 = vst [vmem:[%s213_s7 + $0x8] sm:$0xff] %v2320_v18 }
 0x264   : > { %1561 = vst [vmem:[%s213_s7 + $0x18] sm:$0xff] %v2322_v19 }
 0x265   : > { %2392 = shalt.err (!%p2389_p6)
}
 0x266   : > { %s2393_s30 = scalar_lea.hbm %s2753_s11, 512  ;;  %s2397_s26 = scalar_lea.hbm %s2803_s3, 1024 }
 0x267   : > { %p2394_p7 = scmp.ne.s32.totalorder %s2753_s11, %s2393_s30  ;;  %p2398_p0 = scmp.lt.u32.totalorder %s2753_s11, %s2803_s3 }
 0x268   : > { %p2399_p4 = scmp.lt.u32.totalorder %s2397_s26, %s2393_s30  ;;  %p2401_p13 = scmp.lt.u32.totalorder %s2393_s30, %s2753_s11 }
 0x269   : > { %p2395_p9 = pnand %p2394_p7, %p2815_p8 }
 0x26a   : > { %p2400_p1 = por %p2399_p4, %p2398_p0 }
 0x26b   : > { %p2396_p12 = pneg %p2395_p9 }
 0x26c   : > { %p2402_p10 = por %p2401_p13, %p2400_p1 }
 0x26e   : > { %p2403_p11 = pnand %p2402_p10, %p2396_p12 }
 0x270   : > { %2406 = shalt.err (!%p2403_p11)
}
 0x271   : > { %2117 = dma.vmem_to_hbm [thread:$0]  (%p2815_p8), %s2755_s8, 512, %s2753_s11, %s1563_s15  }
 0x272 PF: > { %p2134_p2 = scmp.ge.s32.totalorder %s2465_s17, 2  ;;  %s1591_s4 = sand.u32 1, %s2445_s12  }
 0x273   : > { %p2816_p3 = scmp.ne.s32.totalorder %s2809_s24, 0  ;;  %s1592_s6 = scalar_lea.sflag [#allocation4], %s1591_s4 }
 0x275   : > { %p2127_p5 = pnand %p2134_p2, %p2816_p3 }
 0x277   : > { %2440 = dma.done.wait (!%p2127_p5), %s1592_s6, 512  }
 0x278   : > { %2442 = vsyncadd (!%p2127_p5), %s1592_s6, 4294966784  ;;  %s18_s17 = sadd.s32 1, %s2465_s17   ;;  %s2817_s12 = smov %s2449_s13 }
 0x279   : > { %p15_p6 = scmp.ge.s32.totalorder %s18_s17, 4   ;;  %s2818_s13 = smov %s2453_s14 }
 0x27a   : > { %s2819_s14 = smov %s2546_s25  ;;  %s2820_s15 = smov %s2461_s16 }
 0x27b   : > { %s2821_s16 = smov %s2823_s20  ;;  %17 = sbr.rel (!%p15_p6) target bundleno = 6 (0x6), region = 76 }
 0x282   :  { %1597 = vsyncpa [#allocation3], 1 }
 0x283   :  { %1599 = vsyncpa [#allocation3 + $0x1], 1 }
 0x284   :  { %1600 = vsyncpa [#allocation6], 1 }
 0x285   :  { %1601 = vsyncpa [#allocation4], 1 }
 0x286   :  { %1603 = vsyncpa [#allocation4 + $0x1], 1 }

</bundles_post_ra>
